<compile_context>
chip_gen: v7x
topology: tpu7x:2x2x1
jax: 0.10.0
libtpu: 0.0.40
codegen_flags: <defaults>
</compile_context>

<pallas_src>
import jax
import jax.numpy as jnp
from jax.experimental import pallas as pl
from jax.experimental.pallas import tpu as pltpu


# splash-attention-style "A @ B^T" contraction: contract last dims of both
# operands; the rhs free (batch) dim lands on the LANE axis of the result.
_NT_DIM_NUMBERS = (((1,), (1,)), ((), ()))

# VMEM budget: a (block_n, 16) f32 activation block is lane-padded to 128 ->
# block_n * 512 B; x2 inputs x2 pipeline buffers + the (block_n, H) f32
# intermediate.  block_n = 4096 keeps this ~12 MiB, well inside the 32 MiB
# scoped default that also holds on v7x (64 MiB physical per TC).
_MAX_BLOCK_N = 4096
_VMEM_LIMIT_BYTES = 32 * 1024 * 1024

# Below this many rows a fused XLA expression beats the custom-call launch +
# pipeline warm-up (whole forward is ~1 MFLOP / ~100s of KB at H=32).
_PALLAS_MIN_ROWS = 4096


def _round_up(x, m):
    return ((x + m - 1) // m) * m


def _inbo_kernel(emb_ref, pos_ref, w1t_ref, w1b_ref, b1_ref, w2_ref, b2_ref,
                 out_ref):
    """One batch tile.

    emb: [TN, De]   pos: [TN, Dp]          (compute dtype: f32 or bf16)
    w1t: [De, H]    w1b: [Dp, H]           (compute dtype)
    b1:  [1, H] f32   w2: [8, H] f32 (row-broadcast)   b2: (1,) f32 in SMEM
    out: [1, 1, TN]  (lane-dense row)
    """
    # Layer 1: fused concat -> two MXU matmuls into one f32 accumulator.
    h = jnp.dot(emb_ref[...], w1t_ref[...], preferred_element_type=jnp.float32)
    h = h + jnp.dot(pos_ref[...], w1b_ref[...],
                    preferred_element_type=jnp.float32)
    h = jnp.maximum(h + b1_ref[...], 0.0)        # bias + ReLU stay f32 (VPU)

    # Layer 2 (output width 1): contract over H with the batch on the lane
    # axis of the result so the store is a dense (1, TN) row instead of a
    # masked (TN, 1) column.  W2 is pre-broadcast to 8 sublanes (avoids an
    # M=1 MXU operand); take row 0 of the identical rows.
    y = jax.lax.dot_general(w2_ref[...], h, _NT_DIM_NUMBERS,
                            preferred_element_type=jnp.float32)     # (8, TN)
    y = y[0:1, :] + b2_ref[0]                                       # (1, TN)
    res = jnp.maximum(y, 0.0).astype(out_ref.dtype)
    out_ref[...] = res[None]                                        # (1, 1, TN)


def prepare_inbo_params(params, d_emb, *, compute_dtype=None):
    """One-time weight prep (transpose + row split + casts), hoisted out of
    the per-call path so repeated forwards don't re-emit transposes/casts."""
    w1 = jnp.asarray(params["w1"])
    H = w1.shape[0]
    assert 0 < d_emb < H, "d_emb must split the hidden dimension"
    w1_t = w1.T                                    # [H_in, H_out]
    w1_top = w1_t[:d_emb, :]                       # [De, H]
    w1_bot = w1_t[d_emb:, :]                       # [Dp, H]
    if compute_dtype is not None:
        w1_top = w1_top.astype(compute_dtype)
        w1_bot = w1_bot.astype(compute_dtype)
    b1 = jnp.asarray(params["b1"]).reshape(1, H).astype(jnp.float32)
    w2_rows = jnp.broadcast_to(
        jnp.asarray(params["w2"]).reshape(1, H).astype(jnp.float32), (8, H))
    b2 = jnp.asarray(params["b2"]).reshape(1).astype(jnp.float32)
    return {"w1_top": w1_top, "w1_bot": w1_bot, "b1": b1, "w2_rows": w2_rows,
            "b2": b2, "d_emb": d_emb, "compute_dtype": compute_dtype}


def _select_block_n(N, block_n, align):
    """Batch-tile selection: big tiles (>=1024), grow with N, VMEM-capped,
    and >=2 balanced steps for large N so v7x's 2 TCs both get work."""
    if block_n is None:
        if N <= 1024:
            block_n = N
        else:
            block_n = min(_MAX_BLOCK_N,
                          max(1024, _round_up(pl.cdiv(N, 4), align)))
    block_n = min(block_n, _MAX_BLOCK_N)
    if N <= block_n:
        return N, 1                       # single full-extent block
    block_n = max(align, (block_n // align) * align)
    block_n = min(block_n, _round_up(pl.cdiv(N, 2), align))   # >=2 balanced steps
    return block_n, pl.cdiv(N, block_n)


def _inbo_xla(embeddings, positive, p, out_dtype):
    """Fused XLA fallback for small batches."""
    emb, pos = embeddings, positive
    cd = p["compute_dtype"]
    if cd is not None:
        emb = emb.astype(cd)
        pos = pos.astype(cd)
    h = (jnp.dot(emb, p["w1_top"], preferred_element_type=jnp.float32)
         + jnp.dot(pos, p["w1_bot"], preferred_element_type=jnp.float32))
    h = jnp.maximum(h + p["b1"], 0.0)
    y = jnp.dot(h, p["w2_rows"][0:1, :].T,
                preferred_element_type=jnp.float32) + p["b2"]
    return jnp.maximum(y, 0.0).astype(out_dtype)


def inbo_forward(embeddings, positive, params, *, block_n=None,
                 compute_dtype=None, use_pallas=None):
    """InBo forward.  embeddings: [N, De], positive: [N, Dp], De + Dp == H.

    `params` may be raw ({"w1","b1","w2","b2"}) or the output of
    prepare_inbo_params (preferred: prep is done once, not per call).
    """
    N, d_emb = embeddings.shape
    _, d_pos = positive.shape
    if "w1_top" not in params:
        params = prepare_inbo_params(params, d_emb, compute_dtype=compute_dtype)
    assert params["d_emb"] == d_emb, "prepared params split does not match inputs"
    compute_dtype = params["compute_dtype"]
    H = params["w1_top"].shape[1]
    assert d_emb + d_pos == H
    out_dtype = embeddings.dtype

    if use_pallas is None:
        use_pallas = N >= _PALLAS_MIN_ROWS
    if not use_pallas:
        return _inbo_xla(embeddings, positive, params, out_dtype)

    emb, pos = embeddings, positive
    if compute_dtype is not None:
        emb = emb.astype(compute_dtype)
        pos = pos.astype(compute_dtype)

    # bf16 packs 2 rows per sublane -> 32-row alignment; f32 needs only 8.
    align = 8 if compute_dtype in (None, jnp.float32) else 32
    block_n, num_tiles = _select_block_n(N, block_n, align)

    # TODO(synk): if the upstream producer can emit a single contiguous [N,H]
    # activation, collapse emb/pos into one input + one matmul (halves the
    # per-step DMA descriptor count); with separate producers the current
    # split already avoids the concat HBM round trip.
    out = pl.pallas_call(
        _inbo_kernel,
        out_shape=jax.ShapeDtypeStruct((num_tiles, 1, block_n), out_dtype),
        grid=(num_tiles,),
        in_specs=[
            pl.BlockSpec((block_n, d_emb), lambda i: (i, 0)),   # emb tile (pipelined)
            pl.BlockSpec((block_n, d_pos), lambda i: (i, 0)),   # pos tile (pipelined)
            pl.BlockSpec((d_emb, H), lambda i: (0, 0)),         # W1 top   (resident)
            pl.BlockSpec((d_pos, H), lambda i: (0, 0)),         # W1 bot   (resident)
            pl.BlockSpec((1, H), lambda i: (0, 0)),             # b1       (resident)
            pl.BlockSpec((8, H), lambda i: (0, 0)),             # W2 rows  (resident)
            pl.BlockSpec(memory_space=pltpu.MemorySpace.SMEM),  # b2 scalar
        ],
        out_specs=pl.BlockSpec((1, 1, block_n), lambda i: (i, 0, 0)),
        compiler_params=pltpu.CompilerParams(
            dimension_semantics=("parallel",),       # v7x: shard batch over 2 TCs
            vmem_limit_bytes=_VMEM_LIMIT_BYTES,      # explicit VMEM budget
        ),
    )(emb, pos, params["w1_top"], params["w1_bot"], params["b1"],
      params["w2_rows"], params["b2"])

    # Lane-dense slab (num_tiles, 1, block_n) -> (N, 1); padded tail rows of a
    # ragged last tile are sliced off here.
    return out.reshape(num_tiles * block_n)[:N].reshape(N, 1)


def init_inbo_params(key, hidden_size, dtype=jnp.float32):
    """torch.nn.Linear.reset_parameters(): U(-1/sqrt(fan_in), 1/sqrt(fan_in))."""
    k1, k2, k3, k4 = jax.random.split(key, 4)
    bound = 1.0 / (hidden_size ** 0.5)
    return {
        "w1": jax.random.uniform(k1, (hidden_size, hidden_size), dtype,
                                 -bound, bound),   # lin1.weight [out=H, in=H]
        "b1": jax.random.uniform(k2, (hidden_size,), dtype, -bound, bound),
        "w2": jax.random.uniform(k3, (1, hidden_size), dtype,
                                 -bound, bound),   # lin2.weight [out=1, in=H]
        "b2": jax.random.uniform(k4, (1,), dtype, -bound, bound),
    }


if __name__ == "__main__":
    key = jax.random.PRNGKey(0)
    k_emb, k_pos, k_par = jax.random.split(key, 3)

    hidden = 32            # InBo hidden_size
    half = hidden // 2     # embeddings / positive each carry H/2 features
    N = 2500               # -> 3 grid steps of 1024 rows, ragged last tile

    embeddings = jax.random.normal(k_emb, (N, half), jnp.float32)
    positive = jax.random.normal(k_pos, (N, half), jnp.float32)
    params = init_inbo_params(k_par, hidden)

    # Pure-JAX reference of the PyTorch forward.
    cat_x = jnp.concatenate((embeddings, positive), axis=1)
    ref = jnp.maximum(
        jnp.dot(cat_x, params["w1"].T, precision=jax.lax.Precision.HIGHEST)
        + params["b1"], 0.0)
    ref = jnp.maximum(
        jnp.dot(ref, params["w2"].T, precision=jax.lax.Precision.HIGHEST)
        + params["b2"], 0.0)

    # f32 Pallas path (weights prepared once, reused across calls).
    prep_f32 = prepare_inbo_params(params, d_emb=half)
    out = jax.block_until_ready(
        inbo_forward(embeddings, positive, prep_f32, use_pallas=True))
    assert out.shape == (N, 1)
    err = float(jnp.max(jnp.abs(out - ref)))
    assert err < 1e-3, "f32 max abs err %g" % err

    # bf16 MXU operands with f32 accumulation — the MXU / W1-DMA fast path.
    prep_bf16 = prepare_inbo_params(params, d_emb=half,
                                    compute_dtype=jnp.bfloat16)
    out_bf16 = jax.block_until_ready(
        inbo_forward(embeddings, positive, prep_bf16, use_pallas=True))
    assert out_bf16.shape == (N, 1)
    err_bf16 = float(jnp.max(jnp.abs(out_bf16 - ref)))
    assert err_bf16 < 5e-2, "bf16 max abs err %g" % err_bf16

    # Small-batch auto path: size gate falls back to the fused XLA expression.
    out_small = jax.block_until_ready(
        inbo_forward(embeddings[:64], positive[:64], prep_f32))
    err_small = float(jnp.max(jnp.abs(out_small - ref[:64])))
    assert err_small < 1e-3, "fallback max abs err %g" % err_small

    print("KERNEL_OK")
</pallas_src>

<mosaic_0001>
module attributes {stable_mosaic.version = 11 : i64} {
  func.func @_inbo_kernel(%arg0: i32, %arg1: memref<1024x16xf32, #tpu.memory_space<vmem>>, %arg2: memref<1024x16xf32, #tpu.memory_space<vmem>>, %arg3: memref<16x32xf32, #tpu.memory_space<vmem>>, %arg4: memref<16x32xf32, #tpu.memory_space<vmem>>, %arg5: memref<1x32xf32, #tpu.memory_space<vmem>>, %arg6: memref<8x32xf32, #tpu.memory_space<vmem>>, %arg7: memref<1xf32, #tpu.memory_space<smem>>, %arg8: memref<1x1x1024xf32, #tpu.memory_space<vmem>>) attributes {dimension_semantics = [#tpu.dimension_semantics<parallel>], iteration_bounds = array<i64: 3>, scalar_prefetch = 0 : i64, scratch_operands = 0 : i64, tpu.core_type = #tpu.core_type<tc>, window_params = [{transform_indices = @transform_0, window_bounds = array<i64: 1024, 16>}, {transform_indices = @transform_1, window_bounds = array<i64: 1024, 16>}, {pipeline_mode = #tpu.pipeline_mode<synchronous>, transform_indices = @transform_2, window_bounds = array<i64: 16, 32>}, {pipeline_mode = #tpu.pipeline_mode<synchronous>, transform_indices = @transform_3, window_bounds = array<i64: 16, 32>}, {pipeline_mode = #tpu.pipeline_mode<synchronous>, transform_indices = @transform_4, window_bounds = array<i64: 1, 32>}, {pipeline_mode = #tpu.pipeline_mode<synchronous>, transform_indices = @transform_5, window_bounds = array<i64: 8, 32>}, {transform_indices = @transform_6, window_bounds = array<i64: 1>}, {transform_indices = @transform_7, window_bounds = array<i64: 1, 1, 1024>}]} {
    %c0 = arith.constant 0 : index
    %c0_0 = arith.constant 0 : index
    %0 = vector.load %arg1[%c0, %c0_0] : memref<1024x16xf32, #tpu.memory_space<vmem>>, vector<1024x16xf32>
    %c0_1 = arith.constant 0 : index
    %c0_2 = arith.constant 0 : index
    %1 = vector.load %arg3[%c0_1, %c0_2] : memref<16x32xf32, #tpu.memory_space<vmem>>, vector<16x32xf32>
    %cst = arith.constant dense<0.000000e+00> : vector<1024x32xf32>
    %2 = tpu.matmul %0, %1, %cst {dimension_numbers = #tpu.dot_dimension_numbers<[1], [0], [0], [1], [0, 0, 1, 1], [], []>} : vector<1024x16xf32>, vector<16x32xf32>, vector<1024x32xf32> -> vector<1024x32xf32>
    %c0_3 = arith.constant 0 : index
    %c0_4 = arith.constant 0 : index
    %3 = vector.load %arg2[%c0_3, %c0_4] : memref<1024x16xf32, #tpu.memory_space<vmem>>, vector<1024x16xf32>
    %c0_5 = arith.constant 0 : index
    %c0_6 = arith.constant 0 : index
    %4 = vector.load %arg4[%c0_5, %c0_6] : memref<16x32xf32, #tpu.memory_space<vmem>>, vector<16x32xf32>
    %cst_7 = arith.constant dense<0.000000e+00> : vector<1024x32xf32>
    %5 = tpu.matmul %3, %4, %cst_7 {dimension_numbers = #tpu.dot_dimension_numbers<[1], [0], [0], [1], [0, 0, 1, 1], [], []>} : vector<1024x16xf32>, vector<16x32xf32>, vector<1024x32xf32> -> vector<1024x32xf32>
    %6 = arith.addf %2, %5 : vector<1024x32xf32>
    %c0_8 = arith.constant 0 : index
    %c0_9 = arith.constant 0 : index
    %7 = vector.load %arg5[%c0_8, %c0_9] : memref<1x32xf32, #tpu.memory_space<vmem>>, vector<1x32xf32>
    %8 = vector.broadcast %7 : vector<1x32xf32> to vector<1024x32xf32>
    %9 = arith.addf %6, %8 : vector<1024x32xf32>
    %cst_10 = arith.constant 0.000000e+00 : f32
    %10 = vector.broadcast %cst_10 : f32 to vector<1024x32xf32>
    %11 = arith.maximumf %9, %10 : vector<1024x32xf32>
    %c0_11 = arith.constant 0 : index
    %c0_12 = arith.constant 0 : index
    %12 = vector.load %arg6[%c0_11, %c0_12] : memref<8x32xf32, #tpu.memory_space<vmem>>, vector<8x32xf32>
    %cst_13 = arith.constant dense<0.000000e+00> : vector<8x1024xf32>
    %13 = tpu.matmul %12, %11, %cst_13 {dimension_numbers = #tpu.dot_dimension_numbers<[1], [1], [0], [0], [0, 0, 1, 0], [], []>} : vector<8x32xf32>, vector<1024x32xf32>, vector<8x1024xf32> -> vector<8x1024xf32>
    %14 = vector.extract_strided_slice %13 {offsets = [0, 0], sizes = [1, 1024], strides = [1, 1]} : vector<8x1024xf32> to vector<1x1024xf32>
    %c0_14 = arith.constant 0 : index
    %15 = memref.load %arg7[%c0_14] : memref<1xf32, #tpu.memory_space<smem>>
    %16 = vector.broadcast %15 : f32 to vector<1x1024xf32>
    %17 = arith.addf %14, %16 : vector<1x1024xf32>
    %cst_15 = arith.constant 0.000000e+00 : f32
    %18 = vector.broadcast %cst_15 : f32 to vector<1x1024xf32>
    %19 = arith.maximumf %17, %18 : vector<1x1024xf32>
    %20 = vector.shape_cast %19 : vector<1x1024xf32> to vector<1x1x1024xf32>
    %c0_16 = arith.constant 0 : index
    %c0_17 = arith.constant 0 : index
    %c0_18 = arith.constant 0 : index
    %21 = vector.load %arg8[%c0_16, %c0_17, %c0_18] : memref<1x1x1024xf32, #tpu.memory_space<vmem>>, vector<1x1x1024xf32>
    tpu.vector_store %arg8[%c0_16, %c0_17, %c0_18], %20 {strides = array<i32>} : memref<1x1x1024xf32, #tpu.memory_space<vmem>>, vector<1x1x1024xf32>,
    return
  }
  func.func @transform_0(%arg0: i32) -> (i32, i32) {
    %c0_i32 = arith.constant 0 : i32
    %c0_i32_0 = arith.constant 0 : i32
    return %arg0, %c0_i32 : i32, i32
  }
  func.func @transform_1(%arg0: i32) -> (i32, i32) {
    %c0_i32 = arith.constant 0 : i32
    %c0_i32_0 = arith.constant 0 : i32
    return %arg0, %c0_i32 : i32, i32
  }
  func.func @transform_2(%arg0: i32) -> (i32, i32) {
    %c0_i32 = arith.constant 0 : i32
    %c0_i32_0 = arith.constant 0 : i32
    %c0_i32_1 = arith.constant 0 : i32
    return %c0_i32, %c0_i32_0 : i32, i32
  }
  func.func @transform_3(%arg0: i32) -> (i32, i32) {
    %c0_i32 = arith.constant 0 : i32
    %c0_i32_0 = arith.constant 0 : i32
    %c0_i32_1 = arith.constant 0 : i32
    return %c0_i32, %c0_i32_0 : i32, i32
  }
  func.func @transform_4(%arg0: i32) -> (i32, i32) {
    %c0_i32 = arith.constant 0 : i32
    %c0_i32_0 = arith.constant 0 : i32
    %c0_i32_1 = arith.constant 0 : i32
    return %c0_i32, %c0_i32_0 : i32, i32
  }
  func.func @transform_5(%arg0: i32) -> (i32, i32) {
    %c0_i32 = arith.constant 0 : i32
    %c0_i32_0 = arith.constant 0 : i32
    %c0_i32_1 = arith.constant 0 : i32
    return %c0_i32, %c0_i32_0 : i32, i32
  }
  func.func @transform_6(%arg0: i32) -> i32 {
    %c0_i32 = arith.constant 0 : i32
    %c0_i32_0 = arith.constant 0 : i32
    return %c0_i32 : i32
  }
  func.func @transform_7(%arg0: i32) -> (i32, i32, i32) {
    %c0_i32 = arith.constant 0 : i32
    %c0_i32_0 = arith.constant 0 : i32
    %c0_i32_1 = arith.constant 0 : i32
    return %arg0, %c0_i32, %c0_i32_0 : i32, i32, i32
  }
}

</mosaic_0001>

<bundles_post_ra>
// kernel: tpu_custom_call.1
= control target key start
LH: loop header
LB: loop body
LE: loop exit
PB: predicated region body
PF: predicated region fallthrough
CT: control target
= control target key end

     0   :  { %s6821_s0 = inlined_call_operand.vmem [shape: f32[2500,16], index: 0, kind: input, shape index: {}]   ;;  %s6822_s1 = inlined_call_operand.vmem [shape: f32[2500,16], index: 1, kind: input, shape index: {}]   ;;  %s6823_s2 = inlined_call_operand.vmem [shape: f32[16,32], index: 2, kind: input, shape index: {}]   ;;  %s6824_s3 = inlined_call_operand.vmem [shape: f32[16,32], index: 3, kind: input, shape index: {}]   ;;  %s6825_s4 = inlined_call_operand.vmem [shape: f32[1,32], index: 4, kind: input, shape index: {}]   ;;  %s6826_s5 = inlined_call_operand.vmem [shape: f32[8,32], index: 5, kind: input, shape index: {}]   ;;  %s6827_s6 = inlined_call_operand.<no memory space> [shape: f32[1], index: 6, kind: input, shape index: {}]   ;;  %s6828_s7 = inlined_call_operand.hbm [shape: f32[3,1,1024], index: 7, kind: output, shape index: {}]  }
   0x1   :  { %12 = sst [smem:[#allocation2]] %s6827_s6 }
   0x2   :  { %13 = vsyncpa [#allocation4], 0 }
   0x3   :  { %15 = vsyncpa [#allocation4 + $0x1], 0  ;;  %s5553_s26 = smov 0   ;;  %s5555_s27 = smov 0  }
   0x4   :  { %s5557_s28 = smov 0   ;;  %s5559_s29 = smov 0  }
   0x5 LB: > { %s3879_s6 = sadd.s32 4294967295, %s5506_s29   ;;  %s3880_s30 = sadd.s32 4294967294, %s5506_s29   ;;  %s5506_s29 = sphi %s5559_s29, %s6890_s29   ;;  %s5502_s28 = sphi %s5557_s28, %s6889_s28   ;;  %s5498_s27 = sphi %s5555_s27, %s6888_s27   ;;  %s5494_s26 = sphi %s5553_s26, %s6887_s26  }
   0x6   : > { %s5576_s8 = sadd.s32 1, %s5506_s29   ;;  %s185_s9 = sadd.s32 1, %s5502_s28 }
   0x7   : > { %s182_s10 = ssub.s32 %s5506_s29, %s5576_s8  ;;  %p195_p0 = scmp.ne.s32.totalorder %s5502_s28, %s5498_s27 }
   0x8   : > { %p183_p1 = scmp.eq.s32.totalorder %s182_s10, 0  ;;  %p196_p2 = scmp.eq.s32.totalorder %s3879_s6, 2 }
   0x9   : > { %p201_p3 = scmp.ne.s32.totalorder %s5498_s27, %s5494_s26  ;;  %p202_p4 = scmp.eq.s32.totalorder %s3880_s30, 2 }
   0xa   : > { %s5586_s11 = scalar_select %p183_p1, %s5502_s28, %s185_s9  }
   0xb   : > { %p5588_p5 = por %p196_p2, %p195_p0  ;;  %p5592_p6 = por %p202_p4, %p201_p3 }
   0xc   : > { %p3883_p7 = scmp.ge.s32.totalorder %s5506_s29, 1  ;;  %p269_p8 = scmp.lt.s32.totalorder %s5506_s29, 4 }
   0xe   : > { %p270_p9 = pnand %p3883_p7, %p269_p8 }
  0x10   : > { %273 = sbr.rel (%p270_p9) target bundleno = 882 (0x372), region = 48 }
  0x17   : > { %v600_v0 = vld [vmem:[%s6824_s3] sm:$0xff]  ;;  %v601_v1 = vld [vmem:[%s6824_s3 + $0x8] sm:$0xff]  ;;  %s5604_s18 = sshll.u32 %s3879_s6, 7  ;;  %vm602_vm0 = vcmask 130048   ;;  %vm3045_vm1 = vcmask 261120   ;;  %s311_s25 = sand.u32 1, %s5498_s27  }
  0x18   : > { %v470_v2 = vld [vmem:[%s6823_s2] sm:$0xff]  ;;  %v5072_v3 = vpack.c.bf16 %v601_v1, %v600_v0  ;;  %p319_p10 = scmp.lt.s32.totalorder %s5604_s18, 312  ;;  %v471_v4 = vld [vmem:[%s6823_s2 + $0x8] sm:$0xff]  ;;  %vm6256_vm2 = vmpackc.low %vm3045_vm1, %vm3045_vm1  ;;  %s3884_s6 = sshll.u32 %s311_s25, 3 }
  0x19   : > { %v5076_v5 = vpack.c.bf16 %v471_v4, %v470_v2  ;;  %s6779_s15 = scalar_lea.hbm %s6828_s7, %s5604_s18  ;;  %s3795_s16 = scalar_lea.sflag [#allocation4], %s311_s25 }
  0x1a   : > { %5073 = vmatprep.subr.bf16.mxu0 %v5072_v3  ;;  %s5614_s23 = scalar_select %p319_p10, %s5604_s18, 312  ;;  %5272 = vmatprep.subr.bf16.mxu1 %v5072_v3 }
  0x1b   : > { %5075 = vmatpush3.bf16.msra.mxu0 %v5072_v3  ;;  %5273 = vmatpush3.bf16.msra.mxu1 %v5072_v3  ;;  %s5509_s19 = smov [#allocation3]  }
  0x1c   : > { %s3886_s24 = sshll.u32 %s5614_s23, 3  ;;  %5077 = vmatprep.subr.bf16.mxu0 %v5076_v5  ;;  %s5448_s20 = sshll.u32 %s5509_s19, 4  ;;  %s5449_s20 = int_to_ptr.vmem [resolvable:$false] %s5448_s20 }
  0x1d   : > { %s5622_s30 = scalar_lea.vmem %s6822_s1, %s3886_s24  ;;  %s5749_s14 = scalar_lea.vmem %s6821_s0, %s3886_s24 }
  0x1e   : > { %v472_v6 = vld [vmem:[%s5622_s30] sm:$0xff]  ;;  %v473_v7 = vld [vmem:[%s5622_s30 + $0x8] sm:$0xff]  ;;  %v474_v8 = vld [vmem:[%s5622_s30 + $0x10] sm:$0xff]  ;;  %s3717_s24 = sld [smem:[#allocation2]]  ;;  %s5450_s21 = scalar_lea.vmem %s5449_s20, 256 }
  0x1f   : > { %4684 = vmatprep.mubr.msk.f32.mxu0 %vm602_vm0, %v472_v6  ;;  %v475_v9 = vld [vmem:[%s5622_s30 + $0x18] sm:$0xff]  ;;  %v476_v10 = vld [vmem:[%s5622_s30 + $0x20] sm:$0xff]  ;;  %v477_v11 = vld [vmem:[%s5622_s30 + $0x28] sm:$0xff] }
  0x20   : > { %4685 = vmatmul.mubr.msk.f32.vlgmr.msra.gmra.mrb[0].mxu0 %vm602_vm0, %v473_v7  ;;  %v478_v12 = vld [vmem:[%s5622_s30 + $0x30] sm:$0xff]  ;;  %v479_v13 = vld [vmem:[%s5622_s30 + $0x38] sm:$0xff]  ;;  %v480_v14 = vld [vmem:[%s5622_s30 + $0x40] sm:$0xff] }
  0x21   : > { %4687 = vmatprep.mubr.msk.f32.mxu0 %vm602_vm0, %v474_v8  ;;  %5079 = vmatpush3.bf16.msra.mxu0 %v5076_v5  ;;  %v481_v15 = vld [vmem:[%s5622_s30 + $0x48] sm:$0xff]  ;;  %v482_v16 = vld [vmem:[%s5622_s30 + $0x50] sm:$0xff]  ;;  %v483_v17 = vld [vmem:[%s5622_s30 + $0x58] sm:$0xff] }
  0x22   : > { %v484_v18 = vld [vmem:[%s5622_s30 + $0x60] sm:$0xff]  ;;  %v485_v19 = vld [vmem:[%s5622_s30 + $0x68] sm:$0xff]  ;;  %v486_v20 = vld [vmem:[%s5622_s30 + $0x70] sm:$0xff] }
  0x23   : > { %v487_v21 = vld [vmem:[%s5622_s30 + $0x78] sm:$0xff]  ;;  %v488_v22 = vld [vmem:[%s5622_s30 + $0x80] sm:$0xff]  ;;  %v489_v23 = vld [vmem:[%s5622_s30 + $0x88] sm:$0xff] }
  0x24   : > { %4688 = vmatmul.mubr.msk.f32.gmra.mrb[2].mxu0 %vm602_vm0, %v475_v9  ;;  %v490_v24 = vld [vmem:[%s5622_s30 + $0x90] sm:$0xff]  ;;  %v491_v25 = vld [vmem:[%s5622_s30 + $0x98] sm:$0xff]  ;;  %v492_v26 = vld [vmem:[%s5622_s30 + $0xa0] sm:$0xff] }
  0x25   : > { %4690 = vmatprep.mubr.msk.f32.mxu0 %vm602_vm0, %v476_v10  ;;  %v493_v27 = vld [vmem:[%s5622_s30 + $0xa8] sm:$0xff]  ;;  %v494_v28 = vld [vmem:[%s5622_s30 + $0xb0] sm:$0xff]  ;;  %v495_v29 = vld [vmem:[%s5622_s30 + $0xb8] sm:$0xff] }
  0x26   : > { %v496_v30 = vld [vmem:[%s5622_s30 + $0xc0] sm:$0xff]  ;;  %v497_v31 = vld [vmem:[%s5622_s30 + $0xc8] sm:$0xff]  ;;  %v498_v32 = vld [vmem:[%s5622_s30 + $0xd0] sm:$0xff] }
  0x27   : > { %v499_v33 = vld [vmem:[%s5622_s30 + $0xd8] sm:$0xff]  ;;  %v500_v34 = vld [vmem:[%s5622_s30 + $0xe0] sm:$0xff]  ;;  %v501_v35 = vld [vmem:[%s5622_s30 + $0xe8] sm:$0xff] }
  0x28   : > { %4691 = vmatmul.mubr.msk.f32.gmra.mrb[4].mxu0 %vm602_vm0, %v477_v11  ;;  %v502_v36 = vld [vmem:[%s5622_s30 + $0xf0] sm:$0xff]  ;;  %v503_v37 = vld [vmem:[%s5622_s30 + $0xf8] sm:$0xff]  ;;  %v504_v38 = vld [vmem:[%s5622_s30 + $0x100] sm:$0xff] }
  0x29   : > { %4693 = vmatprep.mubr.msk.f32.mxu0 %vm602_vm0, %v478_v12  ;;  %v505_v39 = vld [vmem:[%s5622_s30 + $0x108] sm:$0xff]  ;;  %v506_v40 = vld [vmem:[%s5622_s30 + $0x110] sm:$0xff]  ;;  %v507_v41 = vld [vmem:[%s5622_s30 + $0x118] sm:$0xff] }
  0x2a   : > { %v508_v42 = vld [vmem:[%s5622_s30 + $0x120] sm:$0xff]  ;;  %v522_v43 = vld [vmem:[%s5622_s30 + $0x190] sm:$0xff]  ;;  %v509_v44 = vld [vmem:[%s5622_s30 + $0x128] sm:$0xff] }
  0x2b   : > { %4759 = vmatprep.mubr.msk.f32.mxu1 %vm602_vm0, %v522_v43  ;;  %v523_v45 = vld [vmem:[%s5622_s30 + $0x198] sm:$0xff]  ;;  %v510_v46 = vld [vmem:[%s5622_s30 + $0x130] sm:$0xff]  ;;  %v524_v47 = vld [vmem:[%s5622_s30 + $0x1a0] sm:$0xff] }
  0x2c   : > { %4694 = vmatmul.mubr.msk.f32.gmra.mrb[6].mxu0 %vm602_vm0, %v479_v13  ;;  %4760 = vmatmul.mubr.msk.f32.vlgmr.msra.gmra.mrb[0].mxu1 %vm602_vm0, %v523_v45  ;;  %v511_v48 = vld [vmem:[%s5622_s30 + $0x138] sm:$0xff]  ;;  %v525_v49 = vld [vmem:[%s5622_s30 + $0x1a8] sm:$0xff]  ;;  %v512_v50 = vld [vmem:[%s5622_s30 + $0x140] sm:$0xff] }
  0x2d   : > { %4696 = vmatprep.mubr.msk.f32.mxu0 %vm602_vm0, %v480_v14  ;;  %4762 = vmatprep.mubr.msk.f32.mxu1 %vm602_vm0, %v524_v47  ;;  %v526_v51 = vld [vmem:[%s5622_s30 + $0x1b0] sm:$0xff]  ;;  %v513_v52 = vld [vmem:[%s5622_s30 + $0x148] sm:$0xff]  ;;  %v527_v53 = vld [vmem:[%s5622_s30 + $0x1b8] sm:$0xff] }
  0x2e   : > { %v514_v54 = vld [vmem:[%s5622_s30 + $0x150] sm:$0xff]  ;;  %v528_v55 = vld [vmem:[%s5622_s30 + $0x1c0] sm:$0xff]  ;;  %v515_v56 = vld [vmem:[%s5622_s30 + $0x158] sm:$0xff] }
  0x2f   : > { %v529_v57 = vld [vmem:[%s5622_s30 + $0x1c8] sm:$0xff]  ;;  %v516_v58 = vld [vmem:[%s5622_s30 + $0x160] sm:$0xff]  ;;  %v530_v59 = vld [vmem:[%s5622_s30 + $0x1d0] sm:$0xff] }
  0x30   : > { %4697 = vmatmul.mubr.msk.f32.gmra.mrb[8].mxu0 %vm602_vm0, %v481_v15  ;;  %4763 = vmatmul.mubr.msk.f32.gmra.mrb[2].mxu1 %vm602_vm0, %v525_v49  ;;  %v517_v60 = vld [vmem:[%s5622_s30 + $0x168] sm:$0xff]  ;;  %v531_v61 = vld [vmem:[%s5622_s30 + $0x1d8] sm:$0xff]  ;;  %v518_v62 = vld [vmem:[%s5622_s30 + $0x170] sm:$0xff] }
  0x31   : > { %4699 = vmatprep.mubr.msk.f32.mxu0 %vm602_vm0, %v482_v16  ;;  %4765 = vmatprep.mubr.msk.f32.mxu1 %vm602_vm0, %v526_v51  ;;  %v532_v63 = vld [vmem:[%s5622_s30 + $0x1e0] sm:$0xff]  ;;  %v519_v0 = vld [vmem:[%s5622_s30 + $0x178] sm:$0xff]  ;;  %v533_v1 = vld [vmem:[%s5622_s30 + $0x1e8] sm:$0xff] }
  0x32   : > { %v520_v2 = vld [vmem:[%s5622_s30 + $0x180] sm:$0xff]  ;;  %v534_v3 = vld [vmem:[%s5622_s30 + $0x1f0] sm:$0xff]  ;;  %v521_v4 = vld [vmem:[%s5622_s30 + $0x188] sm:$0xff] }
  0x33   : > { %v535_v5 = vld [vmem:[%s5622_s30 + $0x1f8] sm:$0xff]  ;;  %v342_v6 = vld [vmem:[%s5749_s14] sm:$0xff]  ;;  %v343_v8 = vld [vmem:[%s5749_s14 + $0x8] sm:$0xff] }
  0x34   : > { %4700 = vmatmul.mubr.msk.f32.gmra.mrb[10].mxu0 %vm602_vm0, %v483_v17  ;;  %4766 = vmatmul.mubr.msk.f32.gmra.mrb[4].mxu1 %vm602_vm0, %v527_v53  ;;  %v536_v7 = vld [vmem:[%s5622_s30 + $0x200] sm:$0xff]  ;;  %v537_v9 = vld [vmem:[%s5622_s30 + $0x208] sm:$0xff]  ;;  %v344_v10 = vld [vmem:[%s5749_s14 + $0x10] sm:$0xff] }
  0x35   : > { %4702 = vmatprep.mubr.msk.f32.mxu0 %vm602_vm0, %v484_v18  ;;  %4768 = vmatprep.mubr.msk.f32.mxu1 %vm602_vm0, %v528_v55  ;;  %v538_v11 = vld [vmem:[%s5622_s30 + $0x210] sm:$0xff]  ;;  %v345_v12 = vld [vmem:[%s5749_s14 + $0x18] sm:$0xff]  ;;  %v346_v14 = vld [vmem:[%s5749_s14 + $0x20] sm:$0xff] }
  0x36   : > { %v539_v13 = vld [vmem:[%s5622_s30 + $0x218] sm:$0xff]  ;;  %v540_v15 = vld [vmem:[%s5622_s30 + $0x220] sm:$0xff]  ;;  %v347_v16 = vld [vmem:[%s5749_s14 + $0x28] sm:$0xff] }
  0x37   : > { %v541_v17 = vld [vmem:[%s5622_s30 + $0x228] sm:$0xff]  ;;  %v348_v18 = vld [vmem:[%s5749_s14 + $0x30] sm:$0xff]  ;;  %v555_v45 = vld [vmem:[%s5622_s30 + $0x298] sm:$0xff] }
  0x38   : > { %4703 = vmatmul.mubr.msk.f32.gmra.mrb[12].mxu0 %vm602_vm0, %v485_v19  ;;  %4769 = vmatmul.mubr.msk.f32.gmra.mrb[6].mxu1 %vm602_vm0, %v529_v57  ;;  %v542_v19 = vld [vmem:[%s5622_s30 + $0x230] sm:$0xff]  ;;  %v556_v47 = vld [vmem:[%s5622_s30 + $0x2a0] sm:$0xff]  ;;  %v557_v49 = vld [vmem:[%s5622_s30 + $0x2a8] sm:$0xff] }
  0x39   : > { %4705 = vmatprep.mubr.msk.f32.mxu0 %vm602_vm0, %v486_v20  ;;  %4771 = vmatprep.mubr.msk.f32.mxu1 %vm602_vm0, %v530_v59  ;;  %v349_v20 = vld [vmem:[%s5749_s14 + $0x38] sm:$0xff]  ;;  %v554_v43 = vld [vmem:[%s5622_s30 + $0x290] sm:$0xff]  ;;  %v560_v55 = vld [vmem:[%s5622_s30 + $0x2c0] sm:$0xff] }
  0x3a   : > { %v558_v51 = vld [vmem:[%s5622_s30 + $0x2b0] sm:$0xff]  ;;  %v559_v53 = vld [vmem:[%s5622_s30 + $0x2b8] sm:$0xff]  ;;  %v561_v57 = vld [vmem:[%s5622_s30 + $0x2c8] sm:$0xff] }
  0x3b   : > { %v562_v59 = vld [vmem:[%s5622_s30 + $0x2d0] sm:$0xff] }
  0x3c   : > { %4706 = vmatmul.mubr.msk.f32.gmra.mrb[14].mxu0 %vm602_vm0, %v487_v21  ;;  %4772 = vmatmul.mubr.msk.f32.gmra.mrb[8].mxu1 %vm602_vm0, %v531_v61  ;;  %v543_v21 = vld [vmem:[%s5622_s30 + $0x238] sm:$0xff] }
  0x3d   : > { %4708 = vmatprep.mubr.msk.f32.mxu0 %vm602_vm0, %v488_v22  ;;  %4774 = vmatprep.mubr.msk.f32.mxu1 %vm602_vm0, %v532_v63  ;;  %v350_v22 = vld [vmem:[%s5749_s14 + $0x40] sm:$0xff]  ;;  %v563_v61 = vld [vmem:[%s5622_s30 + $0x2d8] sm:$0xff] }
  0x3e   : > { %v564_v63 = vld [vmem:[%s5622_s30 + $0x2e0] sm:$0xff] }
  0x40   : > { %4709 = vmatmul.mubr.msk.f32.gmra.mrb[16].mxu0 %vm602_vm0, %v489_v23  ;;  %4775 = vmatmul.mubr.msk.f32.gmra.mrb[10].mxu1 %vm602_vm0, %v533_v1  ;;  %v544_v23 = vld [vmem:[%s5622_s30 + $0x240] sm:$0xff]  ;;  %v565_v1 = vld [vmem:[%s5622_s30 + $0x2e8] sm:$0xff] }
  0x41   : > { %4711 = vmatprep.mubr.msk.f32.mxu0 %vm602_vm0, %v490_v24  ;;  %4777 = vmatprep.mubr.msk.f32.mxu1 %vm602_vm0, %v534_v3  ;;  %v351_v24 = vld [vmem:[%s5749_s14 + $0x48] sm:$0xff]  ;;  %v566_v3 = vld [vmem:[%s5622_s30 + $0x2f0] sm:$0xff] }
  0x44   : > { %4712 = vmatmul.mubr.msk.f32.gmra.mrb[18].mxu0 %vm602_vm0, %v491_v25  ;;  %4778 = vmatmul.mubr.msk.f32.gmra.mrb[12].mxu1 %vm602_vm0, %v535_v5  ;;  %v545_v25 = vld [vmem:[%s5622_s30 + $0x248] sm:$0xff]  ;;  %v567_v5 = vld [vmem:[%s5622_s30 + $0x2f8] sm:$0xff] }
  0x45   : > { %4714 = vmatprep.mubr.msk.f32.mxu0 %vm602_vm0, %v492_v26  ;;  %4780 = vmatprep.mubr.msk.f32.mxu1 %vm602_vm0, %v536_v7  ;;  %v352_v26 = vld [vmem:[%s5749_s14 + $0x50] sm:$0xff]  ;;  %v568_v7 = vld [vmem:[%s5622_s30 + $0x300] sm:$0xff] }
  0x48   : > { %4715 = vmatmul.mubr.msk.f32.gmra.mrb[20].mxu0 %vm602_vm0, %v493_v27  ;;  %4781 = vmatmul.mubr.msk.f32.gmra.mrb[14].mxu1 %vm602_vm0, %v537_v9  ;;  %v546_v27 = vld [vmem:[%s5622_s30 + $0x250] sm:$0xff]  ;;  %v569_v9 = vld [vmem:[%s5622_s30 + $0x308] sm:$0xff] }
  0x49   : > { %4717 = vmatprep.mubr.msk.f32.mxu0 %vm602_vm0, %v494_v28  ;;  %4783 = vmatprep.mubr.msk.f32.mxu1 %vm602_vm0, %v538_v11  ;;  %v353_v28 = vld [vmem:[%s5749_s14 + $0x58] sm:$0xff]  ;;  %v570_v11 = vld [vmem:[%s5622_s30 + $0x310] sm:$0xff] }
  0x4c   : > { %4718 = vmatmul.mubr.msk.f32.gmra.mrb[22].mxu0 %vm602_vm0, %v495_v29  ;;  %4784 = vmatmul.mubr.msk.f32.gmra.mrb[16].mxu1 %vm602_vm0, %v539_v13  ;;  %v547_v29 = vld [vmem:[%s5622_s30 + $0x258] sm:$0xff] }
  0x4d   : > { %4720 = vmatprep.mubr.msk.f32.mxu0 %vm602_vm0, %v496_v30  ;;  %4786 = vmatprep.mubr.msk.f32.mxu1 %vm602_vm0, %v540_v15  ;;  %v354_v30 = vld [vmem:[%s5749_s14 + $0x60] sm:$0xff]  ;;  %v571_v13 = vld [vmem:[%s5622_s30 + $0x318] sm:$0xff] }
  0x4e   : > { %v572_v15 = vld [vmem:[%s5622_s30 + $0x320] sm:$0xff] }
  0x50   : > { %4721 = vmatmul.mubr.msk.f32.gmra.mrb[24].mxu0 %vm602_vm0, %v497_v31  ;;  %4787 = vmatmul.mubr.msk.f32.gmra.mrb[18].mxu1 %vm602_vm0, %v541_v17  ;;  %v548_v31 = vld [vmem:[%s5622_s30 + $0x260] sm:$0xff]  ;;  %v573_v17 = vld [vmem:[%s5622_s30 + $0x328] sm:$0xff] }
  0x51   : > { %4723 = vmatprep.mubr.msk.f32.mxu0 %vm602_vm0, %v498_v32  ;;  %4789 = vmatprep.mubr.msk.f32.mxu1 %vm602_vm0, %v542_v19  ;;  %v355_v32 = vld [vmem:[%s5749_s14 + $0x68] sm:$0xff]  ;;  %v574_v19 = vld [vmem:[%s5622_s30 + $0x330] sm:$0xff] }
  0x54   : > { %4724 = vmatmul.mubr.msk.f32.gmra.mrb[26].mxu0 %vm602_vm0, %v499_v33  ;;  %4790 = vmatmul.mubr.msk.f32.gmra.mrb[20].mxu1 %vm602_vm0, %v543_v21  ;;  %v549_v33 = vld [vmem:[%s5622_s30 + $0x268] sm:$0xff]  ;;  %v575_v21 = vld [vmem:[%s5622_s30 + $0x338] sm:$0xff] }
  0x55   : > { %4726 = vmatprep.mubr.msk.f32.mxu0 %vm602_vm0, %v500_v34  ;;  %4792 = vmatprep.mubr.msk.f32.mxu1 %vm602_vm0, %v544_v23  ;;  %v356_v34 = vld [vmem:[%s5749_s14 + $0x70] sm:$0xff]  ;;  %v576_v23 = vld [vmem:[%s5622_s30 + $0x340] sm:$0xff] }
  0x58   : > { %4727 = vmatmul.mubr.msk.f32.gmra.mrb[28].mxu0 %vm602_vm0, %v501_v35  ;;  %4793 = vmatmul.mubr.msk.f32.gmra.mrb[22].mxu1 %vm602_vm0, %v545_v25  ;;  %v550_v35 = vld [vmem:[%s5622_s30 + $0x270] sm:$0xff]  ;;  %v577_v25 = vld [vmem:[%s5622_s30 + $0x348] sm:$0xff] }
  0x59   : > { %4729 = vmatprep.mubr.msk.f32.mxu0 %vm602_vm0, %v502_v36  ;;  %4795 = vmatprep.mubr.msk.f32.mxu1 %vm602_vm0, %v546_v27  ;;  %v357_v36 = vld [vmem:[%s5749_s14 + $0x78] sm:$0xff]  ;;  %v578_v27 = vld [vmem:[%s5622_s30 + $0x350] sm:$0xff] }
  0x5c   : > { %4730 = vmatmul.mubr.msk.f32.gmra.mrb[30].mxu0 %vm602_vm0, %v503_v37  ;;  %4796 = vmatmul.mubr.msk.f32.gmra.mrb[24].mxu1 %vm602_vm0, %v547_v29  ;;  %v551_v37 = vld [vmem:[%s5622_s30 + $0x278] sm:$0xff]  ;;  %v386_v29 = vld [vmem:[%s5749_s14 + $0x160] sm:$0xff] }
  0x5d   : > { %4732 = vmatprep.mubr.msk.f32.mxu0 %vm602_vm0, %v504_v38  ;;  %4798 = vmatprep.mubr.msk.f32.mxu1 %vm602_vm0, %v548_v31  ;;  %v358_v38 = vld [vmem:[%s5749_s14 + $0x80] sm:$0xff]  ;;  %v387_v31 = vld [vmem:[%s5749_s14 + $0x168] sm:$0xff] }
  0x60   : > { %4733 = vmatmul.mubr.msk.f32.gmra.mrb[32].mxu0 %vm602_vm0, %v505_v39  ;;  %4799 = vmatmul.mubr.msk.f32.gmra.mrb[26].mxu1 %vm602_vm0, %v549_v33  ;;  %v552_v39 = vld [vmem:[%s5622_s30 + $0x280] sm:$0xff]  ;;  %v388_v33 = vld [vmem:[%s5749_s14 + $0x170] sm:$0xff] }
  0x61   : > { %4735 = vmatprep.mubr.msk.f32.mxu0 %vm602_vm0, %v506_v40  ;;  %4801 = vmatprep.mubr.msk.f32.mxu1 %vm602_vm0, %v550_v35  ;;  %v359_v40 = vld [vmem:[%s5749_s14 + $0x88] sm:$0xff]  ;;  %v389_v35 = vld [vmem:[%s5749_s14 + $0x178] sm:$0xff] }
  0x64   : > { %4736 = vmatmul.mubr.msk.f32.gmra.mrb[34].mxu0 %vm602_vm0, %v507_v41  ;;  %4802 = vmatmul.mubr.msk.f32.gmra.mrb[28].mxu1 %vm602_vm0, %v551_v37  ;;  %v553_v41 = vld [vmem:[%s5622_s30 + $0x288] sm:$0xff]  ;;  %v390_v37 = vld [vmem:[%s5749_s14 + $0x180] sm:$0xff] }
  0x65   : > { %4738 = vmatprep.mubr.msk.f32.mxu0 %vm602_vm0, %v508_v42  ;;  %4804 = vmatprep.mubr.msk.f32.mxu1 %vm602_vm0, %v552_v39  ;;  %v360_v42 = vld [vmem:[%s5749_s14 + $0x90] sm:$0xff]  ;;  %v391_v39 = vld [vmem:[%s5749_s14 + $0x188] sm:$0xff] }
  0x68   : > { %4739 = vmatmul.mubr.msk.f32.gmra.mrb[36].mxu0 %vm602_vm0, %v509_v44  ;;  %4805 = vmatmul.mubr.msk.f32.gmra.mrb[30].mxu1 %vm602_vm0, %v553_v41  ;;  %v361_v44 = vld [vmem:[%s5749_s14 + $0x98] sm:$0xff]  ;;  %v392_v41 = vld [vmem:[%s5749_s14 + $0x190] sm:$0xff] }
  0x69   : > { %4741 = vmatprep.mubr.msk.f32.mxu0 %vm602_vm0, %v510_v46  ;;  %4807 = vmatprep.mubr.msk.f32.mxu1 %vm602_vm0, %v554_v43  ;;  %v362_v46 = vld [vmem:[%s5749_s14 + $0xa0] sm:$0xff]  ;;  %v393_v43 = vld [vmem:[%s5749_s14 + $0x198] sm:$0xff] }
  0x6c   : > { %4742 = vmatmul.mubr.msk.f32.gmra.mrb[38].mxu0 %vm602_vm0, %v511_v48  ;;  %4808 = vmatmul.mubr.msk.f32.gmra.mrb[32].mxu1 %vm602_vm0, %v555_v45  ;;  %v363_v48 = vld [vmem:[%s5749_s14 + $0xa8] sm:$0xff] }
  0x6d   : > { %4744 = vmatprep.mubr.msk.f32.mxu0 %vm602_vm0, %v512_v50  ;;  %4810 = vmatprep.mubr.msk.f32.mxu1 %vm602_vm0, %v556_v47  ;;  %v364_v50 = vld [vmem:[%s5749_s14 + $0xb0] sm:$0xff]  ;;  %v395_v45 = vld [vmem:[%s5749_s14 + $0x1a8] sm:$0xff] }
  0x6e   : > { %v396_v47 = vld [vmem:[%s5749_s14 + $0x1b0] sm:$0xff] }
  0x70   : > { %4745 = vmatmul.mubr.msk.f32.gmra.mrb[40].mxu0 %vm602_vm0, %v513_v52  ;;  %4811 = vmatmul.mubr.msk.f32.gmra.mrb[34].mxu1 %vm602_vm0, %v557_v49  ;;  %v365_v52 = vld [vmem:[%s5749_s14 + $0xb8] sm:$0xff] }
  0x71   : > { %4747 = vmatprep.mubr.msk.f32.mxu0 %vm602_vm0, %v514_v54  ;;  %4813 = vmatprep.mubr.msk.f32.mxu1 %vm602_vm0, %v558_v51  ;;  %v366_v54 = vld [vmem:[%s5749_s14 + $0xc0] sm:$0xff]  ;;  %v397_v49 = vld [vmem:[%s5749_s14 + $0x1b8] sm:$0xff]  ;;  %v399_v51 = vld [vmem:[%s5749_s14 + $0x1c8] sm:$0xff] }
  0x74   : > { %4748 = vmatmul.mubr.msk.f32.gmra.mrb[42].mxu0 %vm602_vm0, %v515_v56  ;;  %4814 = vmatmul.mubr.msk.f32.gmra.mrb[36].mxu1 %vm602_vm0, %v559_v53  ;;  %v367_v56 = vld [vmem:[%s5749_s14 + $0xc8] sm:$0xff]  ;;  %v400_v53 = vld [vmem:[%s5749_s14 + $0x1d0] sm:$0xff] }
  0x75   : > { %4750 = vmatprep.mubr.msk.f32.mxu0 %vm602_vm0, %v516_v58  ;;  %4816 = vmatprep.mubr.msk.f32.mxu1 %vm602_vm0, %v560_v55  ;;  %v368_v58 = vld [vmem:[%s5749_s14 + $0xd0] sm:$0xff]  ;;  %v401_v55 = vld [vmem:[%s5749_s14 + $0x1d8] sm:$0xff] }
  0x78   : > { %4751 = vmatmul.mubr.msk.f32.gmra.mrb[44].mxu0 %vm602_vm0, %v517_v60  ;;  %4817 = vmatmul.mubr.msk.f32.gmra.mrb[38].mxu1 %vm602_vm0, %v561_v57  ;;  %v369_v60 = vld [vmem:[%s5749_s14 + $0xd8] sm:$0xff]  ;;  %v403_v57 = vld [vmem:[%s5749_s14 + $0x1e8] sm:$0xff] }
  0x79   : > { %4753 = vmatprep.mubr.msk.f32.mxu0 %vm602_vm0, %v518_v62  ;;  %4819 = vmatprep.mubr.msk.f32.mxu1 %vm602_vm0, %v562_v59  ;;  %v370_v62 = vld [vmem:[%s5749_s14 + $0xe0] sm:$0xff]  ;;  %v404_v59 = vld [vmem:[%s5749_s14 + $0x1f0] sm:$0xff] }
  0x7c   : > { %4754 = vmatmul.mubr.msk.f32.gmra.mrb[46].mxu0 %vm602_vm0, %v519_v0  ;;  %4820 = vmatmul.mubr.msk.f32.gmra.mrb[40].mxu1 %vm602_vm0, %v563_v61  ;;  %v371_v0 = vld [vmem:[%s5749_s14 + $0xe8] sm:$0xff]  ;;  %v405_v61 = vld [vmem:[%s5749_s14 + $0x1f8] sm:$0xff] }
  0x7d   : > { %4756 = vmatprep.mubr.msk.f32.mxu0 %vm602_vm0, %v520_v2  ;;  %4822 = vmatprep.mubr.msk.f32.mxu1 %vm602_vm0, %v564_v63  ;;  %v372_v2 = vld [vmem:[%s5749_s14 + $0xf0] sm:$0xff]  ;;  %v407_v63 = vld [vmem:[%s5749_s14 + $0x208] sm:$0xff] }
  0x80   : > { %4757 = vmatmul.mubr.msk.f32.gmra.mrb[48].mxu0 %vm602_vm0, %v521_v4  ;;  %4823 = vmatmul.mubr.msk.f32.gmra.mrb[42].mxu1 %vm602_vm0, %v565_v1  ;;  %v373_v4 = vld [vmem:[%s5749_s14 + $0xf8] sm:$0xff]  ;;  %v408_v1 = vld [vmem:[%s5749_s14 + $0x210] sm:$0xff] }
  0x81   : > { %4880 = vmatprep.mubr.msk.f32.mxu0 %vm602_vm0, %v342_v6  ;;  %4825 = vmatprep.mubr.msk.f32.mxu1 %vm602_vm0, %v566_v3  ;;  %v374_v6 = vld [vmem:[%s5749_s14 + $0x100] sm:$0xff]  ;;  %v409_v3 = vld [vmem:[%s5749_s14 + $0x218] sm:$0xff] }
  0x84   : > { %4881 = vmatmul.mubr.msk.f32.vlgmr.msra.gmra.mrb[0].mxu0 %vm602_vm0, %v343_v8  ;;  %4826 = vmatmul.mubr.msk.f32.gmra.mrb[44].mxu1 %vm602_vm0, %v567_v5  ;;  %v375_v8 = vld [vmem:[%s5749_s14 + $0x108] sm:$0xff] }
  0x85   : > { %4883 = vmatprep.mubr.msk.f32.mxu0 %vm602_vm0, %v344_v10  ;;  %4828 = vmatprep.mubr.msk.f32.mxu1 %vm602_vm0, %v568_v7  ;;  %v376_v10 = vld [vmem:[%s5749_s14 + $0x110] sm:$0xff]  ;;  %v411_v5 = vld [vmem:[%s5749_s14 + $0x228] sm:$0xff] }
  0x86   : > { %v412_v7 = vld [vmem:[%s5749_s14 + $0x230] sm:$0xff] }
  0x88   : > { %4884 = vmatmul.mubr.msk.f32.gmra.mrb[2].mxu0 %vm602_vm0, %v345_v12  ;;  %4829 = vmatmul.mubr.msk.f32.gmra.mrb[46].mxu1 %vm602_vm0, %v569_v9  ;;  %v377_v12 = vld [vmem:[%s5749_s14 + $0x118] sm:$0xff] }
  0x89   : > { %4886 = vmatprep.mubr.msk.f32.mxu0 %vm602_vm0, %v346_v14  ;;  %4831 = vmatprep.mubr.msk.f32.mxu1 %vm602_vm0, %v570_v11  ;;  %v378_v14 = vld [vmem:[%s5749_s14 + $0x120] sm:$0xff]  ;;  %v413_v9 = vld [vmem:[%s5749_s14 + $0x238] sm:$0xff]  ;;  %v415_v11 = vld [vmem:[%s5749_s14 + $0x248] sm:$0xff] }
  0x8c   : > { %4887 = vmatmul.mubr.msk.f32.gmra.mrb[4].mxu0 %vm602_vm0, %v347_v16  ;;  %4832 = vmatmul.mubr.msk.f32.gmra.mrb[48].mxu1 %vm602_vm0, %v571_v13  ;;  %v379_v16 = vld [vmem:[%s5749_s14 + $0x128] sm:$0xff]  ;;  %v416_v13 = vld [vmem:[%s5749_s14 + $0x250] sm:$0xff] }
  0x8d   : > { %4889 = vmatprep.mubr.msk.f32.mxu0 %vm602_vm0, %v348_v18  ;;  %4834 = vmatprep.mubr.msk.f32.mxu1 %vm602_vm0, %v572_v15  ;;  %v380_v18 = vld [vmem:[%s5749_s14 + $0x130] sm:$0xff]  ;;  %v417_v15 = vld [vmem:[%s5749_s14 + $0x258] sm:$0xff] }
  0x90   : > { %4890 = vmatmul.mubr.msk.f32.gmra.mrb[6].mxu0 %vm602_vm0, %v349_v20  ;;  %4835 = vmatmul.mubr.msk.f32.gmra.mrb[50].mxu1 %vm602_vm0, %v573_v17  ;;  %v381_v20 = vld [vmem:[%s5749_s14 + $0x138] sm:$0xff]  ;;  %v419_v17 = vld [vmem:[%s5749_s14 + $0x268] sm:$0xff] }
  0x91   : > { %4892 = vmatprep.mubr.msk.f32.mxu0 %vm602_vm0, %v350_v22  ;;  %4837 = vmatprep.mubr.msk.f32.mxu1 %vm602_vm0, %v574_v19  ;;  %v382_v22 = vld [vmem:[%s5749_s14 + $0x140] sm:$0xff]  ;;  %v420_v19 = vld [vmem:[%s5749_s14 + $0x270] sm:$0xff] }
  0x94   : > { %4893 = vmatmul.mubr.msk.f32.gmra.mrb[8].mxu0 %vm602_vm0, %v351_v24  ;;  %4838 = vmatmul.mubr.msk.f32.gmra.mrb[52].mxu1 %vm602_vm0, %v575_v21  ;;  %v383_v24 = vld [vmem:[%s5749_s14 + $0x148] sm:$0xff]  ;;  %v421_v21 = vld [vmem:[%s5749_s14 + $0x278] sm:$0xff] }
  0x95   : > { %4895 = vmatprep.mubr.msk.f32.mxu0 %vm602_vm0, %v352_v26  ;;  %4840 = vmatprep.mubr.msk.f32.mxu1 %vm602_vm0, %v576_v23  ;;  %v384_v26 = vld [vmem:[%s5749_s14 + $0x150] sm:$0xff]  ;;  %v423_v23 = vld [vmem:[%s5749_s14 + $0x288] sm:$0xff] }
  0x98   : > { %4896 = vmatmul.mubr.msk.f32.gmra.mrb[10].mxu0 %vm602_vm0, %v353_v28  ;;  %4841 = vmatmul.mubr.msk.f32.gmra.mrb[54].mxu1 %vm602_vm0, %v577_v25  ;;  %v385_v28 = vld [vmem:[%s5749_s14 + $0x158] sm:$0xff] }
  0x99   : > { %4898 = vmatprep.mubr.msk.f32.mxu0 %vm602_vm0, %v354_v30  ;;  %4843 = vmatprep.mubr.msk.f32.mxu1 %vm602_vm0, %v578_v27  ;;  %v579_v30 = vld [vmem:[%s5622_s30 + $0x358] sm:$0xff]  ;;  %v427_v27 = vld [vmem:[%s5749_s14 + $0x2a8] sm:$0xff] }
  0x9a   : > { %v425_v25 = vld [vmem:[%s5749_s14 + $0x298] sm:$0xff] }
  0x9c   : > { %4899 = vmatmul.mubr.msk.f32.gmra.mrb[12].mxu0 %vm602_vm0, %v355_v32  ;;  %4844 = vmatmul.mubr.msk.f32.gmra.mrb[56].mxu1 %vm602_vm0, %v579_v30  ;;  %v580_v32 = vld [vmem:[%s5622_s30 + $0x360] sm:$0xff] }
  0x9d   : > { %4901 = vmatprep.mubr.msk.f32.mxu0 %vm602_vm0, %v356_v34  ;;  %4846 = vmatprep.mubr.msk.f32.mxu1 %vm602_vm0, %v580_v32  ;;  %v581_v34 = vld [vmem:[%s5622_s30 + $0x368] sm:$0xff]  ;;  %v430_v30 = vld [vmem:[%s5749_s14 + $0x2c0] sm:$0xff]  ;;  %v432_v32 = vld [vmem:[%s5749_s14 + $0x2d0] sm:$0xff] }
  0xa0   : > { %4902 = vmatmul.mubr.msk.f32.gmra.mrb[14].mxu0 %vm602_vm0, %v357_v36  ;;  %4847 = vmatmul.mubr.msk.f32.gmra.mrb[58].mxu1 %vm602_vm0, %v581_v34  ;;  %v582_v36 = vld [vmem:[%s5622_s30 + $0x370] sm:$0xff]  ;;  %v434_v34 = vld [vmem:[%s5749_s14 + $0x2e0] sm:$0xff] }
  0xa1   : > { %4904 = vmatprep.mubr.msk.f32.mxu0 %vm602_vm0, %v358_v38  ;;  %4849 = vmatprep.mubr.msk.f32.mxu1 %vm602_vm0, %v582_v36  ;;  %v583_v38 = vld [vmem:[%s5622_s30 + $0x378] sm:$0xff]  ;;  %v436_v36 = vld [vmem:[%s5749_s14 + $0x2f0] sm:$0xff] }
  0xa4   : > { %4905 = vmatmul.mubr.msk.f32.gmra.mrb[16].mxu0 %vm602_vm0, %v359_v40  ;;  %4850 = vmatmul.mubr.msk.f32.gmra.mrb[60].mxu1 %vm602_vm0, %v583_v38  ;;  %v584_v40 = vld [vmem:[%s5622_s30 + $0x380] sm:$0xff] }
  0xa5   : > { %4907 = vmatprep.mubr.msk.f32.mxu0 %vm602_vm0, %v360_v42  ;;  %4852 = vmatprep.mubr.msk.f32.mxu1 %vm602_vm0, %v584_v40  ;;  %v585_v42 = vld [vmem:[%s5622_s30 + $0x388] sm:$0xff]  ;;  %v438_v40 = vld [vmem:[%s5749_s14 + $0x300] sm:$0xff] }
  0xa8   : > { %4908 = vmatmul.mubr.msk.f32.gmra.mrb[18].mxu0 %vm602_vm0, %v361_v44  ;;  %4853 = vmatmul.mubr.msk.f32.gmra.mrb[62].mxu1 %vm602_vm0, %v585_v42  ;;  %v394_v44 = vld [vmem:[%s5749_s14 + $0x1a0] sm:$0xff] }
  0xa9   : > { %4910 = vmatprep.mubr.msk.f32.mxu0 %vm602_vm0, %v362_v46  ;;  %v586_v46 = vld [vmem:[%s5622_s30 + $0x390] sm:$0xff] }
  0xaa   : > { %4855 = vmatprep.mubr.msk.f32.mxu1 %vm602_vm0, %v586_v46 }
  0xac   : > { %4911 = vmatmul.mubr.msk.f32.gmra.mrb[20].mxu0 %vm602_vm0, %v363_v48  ;;  %v587_v48 = vld [vmem:[%s5622_s30 + $0x398] sm:$0xff] }
  0xad   : > { %4913 = vmatprep.mubr.msk.f32.mxu0 %vm602_vm0, %v364_v50  ;;  %4856 = vmatmul.mubr.msk.f32.gmra.mrb[64].mxu1 %vm602_vm0, %v587_v48  ;;  %v398_v50 = vld [vmem:[%s5749_s14 + $0x1c0] sm:$0xff]  ;;  %v441_v48 = vld [vmem:[%s5749_s14 + $0x318] sm:$0xff] }
  0xb0   : > { %4914 = vmatmul.mubr.msk.f32.gmra.mrb[22].mxu0 %vm602_vm0, %v365_v52  ;;  %v588_v52 = vld [vmem:[%s5622_s30 + $0x3a0] sm:$0xff] }
  0xb1   : > { %4916 = vmatprep.mubr.msk.f32.mxu0 %vm602_vm0, %v366_v54  ;;  %4858 = vmatprep.mubr.msk.f32.mxu1 %vm602_vm0, %v588_v52  ;;  %v589_v54 = vld [vmem:[%s5622_s30 + $0x3a8] sm:$0xff] }
  0xb2   : > { %4859 = vmatmul.mubr.msk.f32.gmra.mrb[66].mxu1 %vm602_vm0, %v589_v54  ;;  %v443_v52 = vld [vmem:[%s5749_s14 + $0x328] sm:$0xff] }
  0xb4   : > { %4917 = vmatmul.mubr.msk.f32.gmra.mrb[24].mxu0 %vm602_vm0, %v367_v56  ;;  %v402_v56 = vld [vmem:[%s5749_s14 + $0x1e0] sm:$0xff] }
  0xb5   : > { %4919 = vmatprep.mubr.msk.f32.mxu0 %vm602_vm0, %v368_v58  ;;  %v590_v58 = vld [vmem:[%s5622_s30 + $0x3b0] sm:$0xff] }
  0xb6   : > { %4861 = vmatprep.mubr.msk.f32.mxu1 %vm602_vm0, %v590_v58 }
  0xb8   : > { %4920 = vmatmul.mubr.msk.f32.gmra.mrb[26].mxu0 %vm602_vm0, %v369_v60  ;;  %v591_v60 = vld [vmem:[%s5622_s30 + $0x3b8] sm:$0xff] }
  0xb9   : > { %4922 = vmatprep.mubr.msk.f32.mxu0 %vm602_vm0, %v370_v62  ;;  %4862 = vmatmul.mubr.msk.f32.gmra.mrb[68].mxu1 %vm602_vm0, %v591_v60  ;;  %v406_v62 = vld [vmem:[%s5749_s14 + $0x200] sm:$0xff]  ;;  %v447_v60 = vld [vmem:[%s5749_s14 + $0x348] sm:$0xff] }
  0xbc   : > { %4923 = vmatmul.mubr.msk.f32.gmra.mrb[28].mxu0 %vm602_vm0, %v371_v0  ;;  %v592_v0 = vld [vmem:[%s5622_s30 + $0x3c0] sm:$0xff] }
  0xbd   : > { %4925 = vmatprep.mubr.msk.f32.mxu0 %vm602_vm0, %v372_v2  ;;  %4864 = vmatprep.mubr.msk.f32.mxu1 %vm602_vm0, %v592_v0  ;;  %v593_v2 = vld [vmem:[%s5622_s30 + $0x3c8] sm:$0xff]  ;;  %v6138_v0 = vld [vmem:[%s6825_s4] ss:$0 sm:$0xff] }
  0xbe   : > { %4865 = vmatmul.mubr.msk.f32.gmra.mrb[70].mxu1 %vm602_vm0, %v593_v2  ;;  %v450_v2 = vld [vmem:[%s5749_s14 + $0x360] sm:$0xff] }
  0xc0   : > { %4926 = vmatmul.mubr.msk.f32.gmra.mrb[30].mxu0 %vm602_vm0, %v373_v4  ;;  %v410_v4 = vld [vmem:[%s5749_s14 + $0x220] sm:$0xff] }
  0xc1   : > { %4928 = vmatprep.mubr.msk.f32.mxu0 %vm602_vm0, %v374_v6  ;;  %v594_v6 = vld [vmem:[%s5622_s30 + $0x3d0] sm:$0xff] }
  0xc2   : > { %4867 = vmatprep.mubr.msk.f32.mxu1 %vm602_vm0, %v594_v6 }
  0xc4   : > { %4929 = vmatmul.mubr.msk.f32.gmra.mrb[32].mxu0 %vm602_vm0, %v375_v8  ;;  %v595_v8 = vld [vmem:[%s5622_s30 + $0x3d8] sm:$0xff] }
  0xc5   : > { %4931 = vmatprep.mubr.msk.f32.mxu0 %vm602_vm0, %v376_v10  ;;  %4868 = vmatmul.mubr.msk.f32.gmra.mrb[72].mxu1 %vm602_vm0, %v595_v8  ;;  %v414_v10 = vld [vmem:[%s5749_s14 + $0x240] sm:$0xff] }
  0xc8   : > { %4932 = vmatmul.mubr.msk.f32.gmra.mrb[34].mxu0 %vm602_vm0, %v377_v12  ;;  %v596_v12 = vld [vmem:[%s5622_s30 + $0x3e0] sm:$0xff] }
  0xc9   : > { %4934 = vmatprep.mubr.msk.f32.mxu0 %vm602_vm0, %v378_v14  ;;  %4870 = vmatprep.mubr.msk.f32.mxu1 %vm602_vm0, %v596_v12  ;;  %v597_v14 = vld [vmem:[%s5622_s30 + $0x3e8] sm:$0xff] }
  0xca   : > { %4871 = vmatmul.mubr.msk.f32.gmra.mrb[74].mxu1 %vm602_vm0, %v597_v14 }
  0xcc   : > { %4935 = vmatmul.mubr.msk.f32.gmra.mrb[36].mxu0 %vm602_vm0, %v379_v16  ;;  %v418_v16 = vld [vmem:[%s5749_s14 + $0x260] sm:$0xff] }
  0xcd   : > { %4937 = vmatprep.mubr.msk.f32.mxu0 %vm602_vm0, %v380_v18  ;;  %v598_v18 = vld [vmem:[%s5622_s30 + $0x3f0] sm:$0xff] }
  0xce   : > { %4873 = vmatprep.mubr.msk.f32.mxu1 %vm602_vm0, %v598_v18 }
  0xd0   : > { %4938 = vmatmul.mubr.msk.f32.gmra.mrb[38].mxu0 %vm602_vm0, %v381_v20  ;;  %v599_v20 = vld [vmem:[%s5622_s30 + $0x3f8] sm:$0xff]  ;;  %s313_s30 = scalar_lea.vmem [#allocation3], %s3884_s6 }
  0xd1   : > { %4940 = vmatprep.mubr.msk.f32.mxu0 %vm602_vm0, %v382_v22  ;;  %4874 = vmatmul.mubr.msk.f32.gmra.mrb[76].mxu1 %vm602_vm0, %v599_v20  ;;  %v422_v22 = vld [vmem:[%s5749_s14 + $0x280] sm:$0xff]  ;;  %v453_v20 = vld [vmem:[%s5749_s14 + $0x378] sm:$0xff]  ;;  %s3809_s9 = sshll.u32 %s313_s30, 4  ;;  %s6781_s9 = int_to_ptr.vmem [resolvable:$true] %s3809_s9 }
  0xd2   : > { %s5444_s17 = scalar_lea.vmem %s6781_s9, 128  ;;  %p5451_p0 = scmp.lt.s32.totalorder %s6781_s9, %s5449_s20 }
  0xd3   : > { %p5445_p11 = scmp.ne.s32.totalorder %s6781_s9, %s5444_s17  ;;  %p5452_p1 = scmp.lt.s32.totalorder %s5450_s21, %s5444_s17 }
  0xd4   : > { %4941 = vmatmul.mubr.msk.f32.gmra.mrb[40].mxu0 %vm602_vm0, %v383_v24  ;;  %v424_v24 = vld [vmem:[%s5749_s14 + $0x290] sm:$0xff] }
  0xd5   : > { %4943 = vmatprep.mubr.msk.f32.mxu0 %vm602_vm0, %v384_v26  ;;  %v426_v26 = vld [vmem:[%s5749_s14 + $0x2a0] sm:$0xff]  ;;  %p5446_p12 = pnand %p5445_p11, %p5588_p5  ;;  %p5453_p2 = por %p5452_p1, %p5451_p0 }
  0xd7   : > { %p5447_p13 = pneg %p5446_p12 }
  0xd8   : > { %4944 = vmatmul.mubr.msk.f32.gmra.mrb[42].mxu0 %vm602_vm0, %v385_v28  ;;  %v428_v28 = vld [vmem:[%s5749_s14 + $0x2b0] sm:$0xff] }
  0xd9   : > { %4946 = vmatprep.mubr.msk.f32.mxu0 %vm602_vm0, %v386_v29  ;;  %v429_v29 = vld [vmem:[%s5749_s14 + $0x2b8] sm:$0xff]  ;;  %p5454_p3 = pnand %p5453_p2, %p5447_p13 }
  0xdc   : > { %4947 = vmatmul.mubr.msk.f32.gmra.mrb[44].mxu0 %vm602_vm0, %v387_v31  ;;  %v431_v31 = vld [vmem:[%s5749_s14 + $0x2c8] sm:$0xff] }
  0xdd   : > { %4949 = vmatprep.mubr.msk.f32.mxu0 %vm602_vm0, %v388_v33  ;;  %v433_v33 = vld [vmem:[%s5749_s14 + $0x2d8] sm:$0xff] }
  0xe0   : > { %4950 = vmatmul.mubr.msk.f32.gmra.mrb[46].mxu0 %vm602_vm0, %v389_v35  ;;  %v435_v35 = vld [vmem:[%s5749_s14 + $0x2e8] sm:$0xff] }
  0xe1   : > { %4952 = vmatprep.mubr.msk.f32.mxu0 %vm602_vm0, %v390_v37 }
  0xe4   : > { %4953 = vmatmul.mubr.msk.f32.gmra.mrb[48].mxu0 %vm602_vm0, %v391_v39  ;;  %v437_v39 = vld [vmem:[%s5749_s14 + $0x2f8] sm:$0xff] }
  0xe5   : > { %4955 = vmatprep.mubr.msk.f32.mxu0 %vm602_vm0, %v392_v41  ;;  %v6086_v41 = vld [vmem:[%s6826_s5] sm:$0xff] }
  0xe6   : > { %4576 = vmatprep.mubr.msk.f32.mxu1 %vm3045_vm1, %v6086_v41 }
  0xe8   : > { %4956 = vmatmul.mubr.msk.f32.gmra.mrb[50].mxu0 %vm602_vm0, %v393_v43 }
  0xe9   : > { %4958 = vmatprep.mubr.msk.f32.mxu0 %vm602_vm0, %v394_v44  ;;  %v439_v44 = vld [vmem:[%s5749_s14 + $0x308] sm:$0xff] }
  0xec   : > { %4959 = vmatmul.mubr.msk.f32.gmra.mrb[52].mxu0 %vm602_vm0, %v395_v45  ;;  %v440_v45 = vld [vmem:[%s5749_s14 + $0x310] sm:$0xff] }
  0xed   : > { %4961 = vmatprep.mubr.msk.f32.mxu0 %vm602_vm0, %v396_v47 }
  0xf0   : > { %4962 = vmatmul.mubr.msk.f32.gmra.mrb[54].mxu0 %vm602_vm0, %v397_v49  ;;  %v442_v49 = vld [vmem:[%s5749_s14 + $0x320] sm:$0xff] }
  0xf1   : > { %4964 = vmatprep.mubr.msk.f32.mxu0 %vm602_vm0, %v398_v50 }
  0xf4   : > { %4965 = vmatmul.mubr.msk.f32.gmra.mrb[56].mxu0 %vm602_vm0, %v399_v51 }
  0xf5   : > { %4967 = vmatprep.mubr.msk.f32.mxu0 %vm602_vm0, %v400_v53  ;;  %v444_v53 = vld [vmem:[%s5749_s14 + $0x330] sm:$0xff] }
  0xf8   : > { %4968 = vmatmul.mubr.msk.f32.gmra.mrb[58].mxu0 %vm602_vm0, %v401_v55 }
  0xf9   : > { %4970 = vmatprep.mubr.msk.f32.mxu0 %vm602_vm0, %v402_v56  ;;  %v445_v56 = vld [vmem:[%s5749_s14 + $0x338] sm:$0xff] }
  0xfc   : > { %4971 = vmatmul.mubr.msk.f32.gmra.mrb[60].mxu0 %vm602_vm0, %v403_v57  ;;  %v446_v57 = vld [vmem:[%s5749_s14 + $0x340] sm:$0xff] }
  0xfd   : > { %4973 = vmatprep.mubr.msk.f32.mxu0 %vm602_vm0, %v404_v59 }
  0xff   : > { %v6075_v37 = vpop.f32.mrb[0].mxu1 }
 0x100   : > { %4974 = vmatmul.mubr.msk.f32.gmra.mrb[62].mxu0 %vm602_vm0, %v405_v61  ;;  %v6077_v38 = vpop.f32.mrb[1].mxu1  ;;  %v448_v61 = vld [vmem:[%s5749_s14 + $0x350] sm:$0xff] }
 0x101   : > { %4976 = vmatprep.mubr.msk.f32.mxu0 %vm602_vm0, %v406_v62 }
 0x103   : > { %v6088_v42 = vpop.f32.mrb[2].mxu1 }
 0x104   : > { %4977 = vmatmul.mubr.msk.f32.gmra.mrb[64].mxu0 %vm602_vm0, %v407_v63  ;;  %v6092_v43 = vpop.f32.mrb[3].mxu1 }
 0x105   : > { %4979 = vmatprep.mubr.msk.f32.mxu0 %vm602_vm0, %v408_v1  ;;  %v449_v1 = vld [vmem:[%s5749_s14 + $0x358] sm:$0xff] }
 0x107   : > { %v6098_v46 = vpop.f32.mrb[4].mxu1 }
 0x108   : > { %4980 = vmatmul.mubr.msk.f32.gmra.mrb[66].mxu0 %vm602_vm0, %v409_v3  ;;  %v6100_v47 = vpop.f32.mrb[5].mxu1 }
 0x109   : > { %4982 = vmatprep.mubr.msk.f32.mxu0 %vm602_vm0, %v410_v4 }
 0x10b   : > { %v6106_v50 = vpop.f32.mrb[6].mxu1 }
 0x10c   : > { %4983 = vmatmul.mubr.msk.f32.gmra.mrb[68].mxu0 %vm602_vm0, %v411_v5  ;;  %v6108_v51 = vpop.f32.mrb[7].mxu1 }
 0x10d   : > { %4985 = vmatprep.mubr.msk.f32.mxu0 %vm602_vm0, %v412_v7 }
 0x10f   : > { %v6114_v54 = vpop.f32.mrb[8].mxu1 }
 0x110   : > { %4986 = vmatmul.mubr.msk.f32.gmra.mrb[70].mxu0 %vm602_vm0, %v413_v9  ;;  %v6116_v55 = vpop.f32.mrb[9].mxu1  ;;  %v451_v9 = vld [vmem:[%s5749_s14 + $0x368] sm:$0xff] }
 0x111   : > { %4988 = vmatprep.mubr.msk.f32.mxu0 %vm602_vm0, %v414_v10 }
 0x113   : > { %v6122_v58 = vpop.f32.mrb[10].mxu1 }
 0x114   : > { %4989 = vmatmul.mubr.msk.f32.gmra.mrb[72].mxu0 %vm602_vm0, %v415_v11  ;;  %v6124_v59 = vpop.f32.mrb[11].mxu1  ;;  %v452_v11 = vld [vmem:[%s5749_s14 + $0x370] sm:$0xff] }
 0x115   : > { %4991 = vmatprep.mubr.msk.f32.mxu0 %vm602_vm0, %v416_v13 }
 0x117   : > { %v6130_v62 = vpop.f32.mrb[12].mxu1 }
 0x118   : > { %4992 = vmatmul.mubr.msk.f32.gmra.mrb[74].mxu0 %vm602_vm0, %v417_v15  ;;  %v6132_v63 = vpop.f32.mrb[13].mxu1 }
 0x119   : > { %4994 = vmatprep.mubr.msk.f32.mxu0 %vm602_vm0, %v418_v16 }
 0x11b   : > { %v6143_v3 = vpop.f32.mrb[14].mxu1 }
 0x11c   : > { %4995 = vmatmul.mubr.msk.f32.gmra.mrb[76].mxu0 %vm602_vm0, %v419_v17  ;;  %v6145_v5 = vpop.f32.mrb[15].mxu1 }
 0x11d   : > { %4997 = vmatprep.mubr.msk.f32.mxu0 %vm602_vm0, %v420_v19 }
 0x11f   : > { %v6153_v12 = vpop.f32.mrb[16].mxu1 }
 0x120   : > { %4998 = vmatmul.mubr.msk.f32.gmra.mrb[78].mxu0 %vm602_vm0, %v421_v21  ;;  %v6155_v15 = vpop.f32.mrb[17].mxu1 }
 0x121   : > { %5000 = vmatprep.mubr.msk.f32.mxu0 %vm602_vm0, %v422_v22  ;;  %v454_v22 = vld [vmem:[%s5749_s14 + $0x380] sm:$0xff] }
 0x124   : > { %5001 = vmatmul.mubr.msk.f32.gmra.mrb[80].mxu0 %vm602_vm0, %v423_v23  ;;  %v6165_v23 = vpop.f32.mrb[18].mxu1 }
 0x125   : > { %5003 = vmatprep.mubr.msk.f32.mxu0 %vm602_vm0, %v424_v24 }
 0x128   : > { %5004 = vmatmul.mubr.msk.f32.gmra.mrb[82].mxu0 %vm602_vm0, %v425_v25 }
 0x129   : > { %5006 = vmatprep.mubr.msk.f32.mxu0 %vm602_vm0, %v426_v26  ;;  %v6167_v26 = vpop.f32.mrb[19].mxu1 }
 0x12c   : > { %5007 = vmatmul.mubr.msk.f32.gmra.mrb[84].mxu0 %vm602_vm0, %v427_v27 }
 0x12d   : > { %5009 = vmatprep.mubr.msk.f32.mxu0 %vm602_vm0, %v428_v28 }
 0x130   : > { %5010 = vmatmul.mubr.msk.f32.gmra.mrb[86].mxu0 %vm602_vm0, %v429_v29 }
 0x131   : > { %5012 = vmatprep.mubr.msk.f32.mxu0 %vm602_vm0, %v430_v30 }
 0x134   : > { %5013 = vmatmul.mubr.msk.f32.gmra.mrb[88].mxu0 %vm602_vm0, %v431_v31  ;;  %v455_v31 = vld [vmem:[%s5749_s14 + $0x388] sm:$0xff] }
 0x135   : > { %5015 = vmatprep.mubr.msk.f32.mxu0 %vm602_vm0, %v432_v32 }
 0x138   : > { %5016 = vmatmul.mubr.msk.f32.gmra.mrb[90].mxu0 %vm602_vm0, %v433_v33  ;;  %v456_v33 = vld [vmem:[%s5749_s14 + $0x390] sm:$0xff] }
 0x139   : > { %5018 = vmatprep.mubr.msk.f32.mxu0 %vm602_vm0, %v434_v34  ;;  %v6177_v34 = vpop.f32.mrb[20].mxu1 }
 0x13c   : > { %5019 = vmatmul.mubr.msk.f32.gmra.mrb[92].mxu0 %vm602_vm0, %v435_v35 }
 0x13d   : > { %5021 = vmatprep.mubr.msk.f32.mxu0 %vm602_vm0, %v436_v36 }
 0x140   : > { %5022 = vmatmul.mubr.msk.f32.gmra.mrb[94].mxu0 %vm602_vm0, %v437_v39  ;;  %v6179_v39 = vpop.f32.mrb[21].mxu1 }
 0x141   : > { %5024 = vmatprep.mubr.msk.f32.mxu0 %vm602_vm0, %v438_v40 }
 0x144   : > { %5025 = vmatmul.mubr.msk.f32.gmra.mrb[96].mxu0 %vm602_vm0, %v439_v44 }
 0x145   : > { %5027 = vmatprep.mubr.msk.f32.mxu0 %vm602_vm0, %v440_v45 }
 0x148   : > { %5028 = vmatmul.mubr.msk.f32.gmra.mrb[98].mxu0 %vm602_vm0, %v441_v48 }
 0x149   : > { %5030 = vmatprep.mubr.msk.f32.mxu0 %vm602_vm0, %v442_v49  ;;  %v457_v49 = vld [vmem:[%s5749_s14 + $0x398] sm:$0xff] }
 0x14c   : > { %5031 = vmatmul.mubr.msk.f32.gmra.mrb[100].mxu0 %vm602_vm0, %v443_v52 }
 0x14d   : > { %5033 = vmatprep.mubr.msk.f32.mxu0 %vm602_vm0, %v444_v53  ;;  %v458_v53 = vld [vmem:[%s5749_s14 + $0x3a0] sm:$0xff] }
 0x150   : > { %5034 = vmatmul.mubr.msk.f32.gmra.mrb[102].mxu0 %vm602_vm0, %v445_v56  ;;  %v6189_v56 = vpop.f32.mrb[22].mxu1 }
 0x151   : > { %5036 = vmatprep.mubr.msk.f32.mxu0 %vm602_vm0, %v446_v57 }
 0x154   : > { %5037 = vmatmul.mubr.msk.f32.gmra.mrb[104].mxu0 %vm602_vm0, %v447_v60 }
 0x155   : > { %5039 = vmatprep.mubr.msk.f32.mxu0 %vm602_vm0, %v448_v61  ;;  %v6191_v61 = vpop.f32.mrb[23].mxu1 }
 0x157   : > { %v4882_v4 = vpop.f32.mrb[0].mxu0 }
 0x158   : > { %v2789_v6 = vadd.f32 %v4882_v4, %v6138_v0  ;;  %v2142_v7 = vpop.f32.mrb[1].mxu0  ;;  %5040 = vmatmul.mubr.msk.f32.gmra.mrb[106].mxu0 %vm602_vm0, %v449_v1 }
 0x159   : > { %v2788_v8 = vadd.f32 %v6138_v0, %v2142_v7  ;;  %5042 = vmatprep.mubr.msk.f32.mxu0 %vm602_vm0, %v450_v2  ;;  %v459_v7 = vld [vmem:[%s5749_s14 + $0x3a8] sm:$0xff] }
 0x15a   : > { %v2917_v10 = vmax.f32 %v2789_v6, 0.0 }
 0x15b   : > { %v2916_v13 = vmax.f32 %v2788_v8, 0.0  ;;  %v4885_v14 = vpop.f32.mrb[2].mxu0 }
 0x15c   : > { %v2791_v16 = vadd.f32 %v4885_v14, %v6138_v0  ;;  %v2152_v17 = vpop.f32.mrb[3].mxu0  ;;  %5043 = vmatmul.mubr.msk.f32.gmra.mrb[108].mxu0 %vm602_vm0, %v451_v9  ;;  %v460_v9 = vld [vmem:[%s5749_s14 + $0x3b0] sm:$0xff] }
 0x15d   : > { %v6159_v18 = vpack.c.bf16 %v2917_v10, %v2916_v13  ;;  %v2790_v19 = vadd.f32 %v6138_v0, %v2152_v17  ;;  %5045 = vmatprep.mubr.msk.f32.mxu0 %vm602_vm0, %v452_v11  ;;  %v6201_v10 = vpop.f32.mrb[24].mxu1 }
 0x15e   : > { %v2919_v21 = vmax.f32 %v2791_v16, 0.0  ;;  %v6203_v14 = vpop.f32.mrb[25].mxu1 }
 0x15f   : > { %v2918_v24 = vmax.f32 %v2790_v19, 0.0  ;;  %v4888_v25 = vpop.f32.mrb[4].mxu0 }
 0x160   : > { %v2793_v27 = vadd.f32 %v4888_v25, %v6138_v0  ;;  %v2162_v28 = vpop.f32.mrb[5].mxu0  ;;  %5046 = vmatmul.mubr.msk.f32.gmra.mrb[110].mxu0 %vm602_vm0, %v453_v20  ;;  %v6213_v25 = vpop.f32.mrb[26].mxu1 }
 0x161   : > { %v6171_v29 = vpack.c.bf16 %v2919_v21, %v2918_v24  ;;  %v2792_v30 = vadd.f32 %v6138_v0, %v2162_v28  ;;  %5048 = vmatprep.mubr.msk.f32.mxu0 %vm602_vm0, %v454_v22  ;;  %v461_v21 = vld [vmem:[%s5749_s14 + $0x3b8] sm:$0xff]  ;;  %v462_v24 = vld [vmem:[%s5749_s14 + $0x3c0] sm:$0xff] }
 0x162   : > { %v2921_v32 = vmax.f32 %v2793_v27, 0.0 }
 0x163   : > { %v2920_v35 = vmax.f32 %v2792_v30, 0.0  ;;  %v4891_v36 = vpop.f32.mrb[6].mxu0  ;;  %v6215_v30 = vpop.f32.mrb[27].mxu1 }
 0x164   : > { %v2795_v40 = vadd.f32 %v4891_v36, %v6138_v0  ;;  %v2172_v44 = vpop.f32.mrb[7].mxu0  ;;  %5049 = vmatmul.mubr.msk.f32.gmra.mrb[112].mxu0 %vm602_vm0, %v455_v31  ;;  %v463_v36 = vld [vmem:[%s5749_s14 + $0x3c8] sm:$0xff] }
 0x165   : > { %v6183_v45 = vpack.c.bf16 %v2921_v32, %v2920_v35  ;;  %v2794_v48 = vadd.f32 %v6138_v0, %v2172_v44  ;;  %5051 = vmatprep.mubr.msk.f32.mxu0 %vm602_vm0, %v456_v33  ;;  %v464_v44 = vld [vmem:[%s5749_s14 + $0x3d0] sm:$0xff] }
 0x166   : > { %v2923_v52 = vmax.f32 %v2795_v40, 0.0 }
 0x167   : > { %v2922_v57 = vmax.f32 %v2794_v48, 0.0  ;;  %v4894_v60 = vpop.f32.mrb[8].mxu0  ;;  %v6225_v48 = vpop.f32.mrb[28].mxu1 }
 0x168   : > { %v2797_v1 = vadd.f32 %v4894_v60, %v6138_v0  ;;  %v2182_v2 = vpop.f32.mrb[9].mxu0  ;;  %5052 = vmatmul.mubr.msk.f32.gmra.mrb[114].mxu0 %vm602_vm0, %v457_v49 }
 0x169   : > { %v6195_v4 = vpack.c.bf16 %v2923_v52, %v2922_v57  ;;  %v2796_v6 = vadd.f32 %v6138_v0, %v2182_v2  ;;  %5054 = vmatprep.mubr.msk.f32.mxu0 %vm602_vm0, %v458_v53  ;;  %v6227_v53 = vpop.f32.mrb[29].mxu1 }
 0x16a   : > { %v2925_v8 = vmax.f32 %v2797_v1, 0.0 }
 0x16b   : > { %v2924_v11 = vmax.f32 %v2796_v6, 0.0  ;;  %v4897_v13 = vpop.f32.mrb[10].mxu0  ;;  %v465_v6 = vld [vmem:[%s5749_s14 + $0x3d8] sm:$0xff] }
 0x16c   : > { %v2799_v16 = vadd.f32 %v4897_v13, %v6138_v0  ;;  %v2192_v17 = vpop.f32.mrb[11].mxu0  ;;  %5055 = vmatmul.mubr.msk.f32.gmra.mrb[116].mxu0 %vm602_vm0, %v459_v7 }
 0x16d   : > { %v6207_v19 = vpack.c.bf16 %v2925_v8, %v2924_v11  ;;  %v2798_v20 = vadd.f32 %v6138_v0, %v2192_v17  ;;  %5057 = vmatprep.mubr.msk.f32.mxu0 %vm602_vm0, %v460_v9  ;;  %v466_v8 = vld [vmem:[%s5749_s14 + $0x3e0] sm:$0xff]  ;;  %v6237_v9 = vpop.f32.mrb[30].mxu1 }
 0x16e   : > { %v2927_v22 = vmax.f32 %v2799_v16, 0.0  ;;  %v6239_v16 = vpop.f32.mrb[31].mxu1 }
 0x16f   : > { %v2926_v27 = vmax.f32 %v2798_v20, 0.0  ;;  %v4900_v28 = vpop.f32.mrb[12].mxu0 }
 0x170   : > { %v2801_v31 = vadd.f32 %v4900_v28, %v6138_v0  ;;  %v2202_v32 = vpop.f32.mrb[13].mxu0  ;;  %5058 = vmatmul.mubr.msk.f32.gmra.mrb[118].mxu0 %vm602_vm0, %v461_v21  ;;  %v468_v28 = vld [vmem:[%s5749_s14 + $0x3f0] sm:$0xff] }
 0x171   : > { %v6219_v33 = vpack.c.bf16 %v2927_v22, %v2926_v27  ;;  %v2800_v35 = vadd.f32 %v6138_v0, %v2202_v32  ;;  %5060 = vmatprep.mubr.msk.f32.mxu0 %vm602_vm0, %v462_v24  ;;  %v467_v24 = vld [vmem:[%s5749_s14 + $0x3e8] sm:$0xff] }
 0x172   : > { %v2929_v40 = vmax.f32 %v2801_v31, 0.0  ;;  %v6249_v31 = vpop.f32.mrb[32].mxu1 }
 0x173   : > { %v2928_v49 = vmax.f32 %v2800_v35, 0.0  ;;  %v4903_v52 = vpop.f32.mrb[14].mxu0 }
 0x174   : > { %v2803_v57 = vadd.f32 %v4903_v52, %v6138_v0  ;;  %v2212_v60 = vpop.f32.mrb[15].mxu0  ;;  %5061 = vmatmul.mubr.msk.f32.gmra.mrb[120].mxu0 %vm602_vm0, %v463_v36  ;;  %v6251_v36 = vpop.f32.mrb[33].mxu1 }
 0x175   : > { %v6231_v1 = vpack.c.bf16 %v2929_v40, %v2928_v49  ;;  %v2802_v2 = vadd.f32 %v6138_v0, %v2212_v60  ;;  %5063 = vmatprep.mubr.msk.f32.mxu0 %vm602_vm0, %v464_v44  ;;  %v469_v60 = vld [vmem:[%s5749_s14 + $0x3f8] sm:$0xff] }
 0x176   : > { %v2931_v7 = vmax.f32 %v2803_v57, 0.0 }
 0x177   : > { %v2930_v11 = vmax.f32 %v2802_v2, 0.0  ;;  %v4906_v13 = vpop.f32.mrb[16].mxu0 }
 0x178   : > { %v2805_v17 = vadd.f32 %v4906_v13, %v6138_v0  ;;  %v2222_v20 = vpop.f32.mrb[17].mxu0  ;;  %5064 = vmatmul.mubr.msk.f32.gmra.mrb[122].mxu0 %vm602_vm0, %v465_v6  ;;  %v6264_v6 = vpop.f32.mrb[34].mxu1 }
 0x179   : > { %v6243_v21 = vpack.c.bf16 %v2931_v7, %v2930_v11  ;;  %v2804_v22 = vadd.f32 %v6138_v0, %v2222_v20  ;;  %5066 = vmatprep.mubr.msk.f32.mxu0 %vm602_vm0, %v466_v8  ;;  %v6268_v11 = vpop.f32.mrb[35].mxu1 }
 0x17a   : > { %v2933_v27 = vmax.f32 %v2805_v17, 0.0 }
 0x17b   : > { %v2932_v32 = vmax.f32 %v2804_v22, 0.0  ;;  %v4909_v35 = vpop.f32.mrb[18].mxu0 }
 0x17c   : > { %v2807_v40 = vadd.f32 %v4909_v35, %v6138_v0  ;;  %v2232_v44 = vpop.f32.mrb[19].mxu0  ;;  %5067 = vmatmul.mubr.msk.f32.gmra.mrb[124].mxu0 %vm602_vm0, %v467_v24 }
 0x17d   : > { %v5080_v52 = vpack.c.bf16 %v2933_v27, %v2932_v32  ;;  %v2806_v57 = vadd.f32 %v6138_v0, %v2232_v44  ;;  %5069 = vmatprep.mubr.msk.f32.mxu0 %vm602_vm0, %v468_v28  ;;  %v6276_v27 = vpop.f32.mrb[36].mxu1 }
 0x17e   : > { %v2935_v2 = vmax.f32 %v2807_v40, 0.0  ;;  %v6280_v35 = vpop.f32.mrb[37].mxu1 }
 0x17f   : > { %v2934_v7 = vmax.f32 %v2806_v57, 0.0  ;;  %v4912_v8 = vpop.f32.mrb[20].mxu0  ;;  %5082 = vmatprep.subr.msk.bf16.mxu1 %vm6256_vm2, %v5080_v52  ;;  %6833 = vst [vmem:[#allocation6_spill] sm:$0xff] %v6280_v35 }
 0x180   : > { %v2809_v13 = vadd.f32 %v4912_v8, %v6138_v0  ;;  %v2242_v17 = vpop.f32.mrb[21].mxu0  ;;  %5085 = vmatpush3.bf16.xpose.msk.msra.mxu1 %vm6256_vm2, %v6159_v18  ;;  %5070 = vmatmul.mubr.msk.f32.gmra.mrb[126].mxu0 %vm602_vm0, %v469_v60  ;;  %v6284_v60 = vpop.f32.mrb[38].mxu1 }
 0x181   : > { %v5086_v20 = vpack.c.bf16 %v2935_v2, %v2934_v7  ;;  %v2808_v22 = vadd.f32 %v6138_v0, %v2242_v17  ;;  %6834 = vst [vmem:[#allocation7_spill] sm:$0xff] %v6284_v60  ;;  %v6286_v8 = vpop.f32.mrb[39].mxu1 }
 0x182   : > { %v2937_v24 = vmax.f32 %v2809_v13, 0.0  ;;  %6835 = vst [vmem:[#allocation8_spill] sm:$0xff] %v6286_v8 }
 0x183   : > { %v2936_v28 = vmax.f32 %v2808_v22, 0.0  ;;  %v4915_v32 = vpop.f32.mrb[22].mxu0  ;;  %5088 = vmatprep.subr.msk.bf16.mxu1 %vm6256_vm2, %v5086_v20 }
 0x184   : > { %v2811_v40 = vadd.f32 %v4915_v32, %v6138_v0  ;;  %v2252_v44 = vpop.f32.mrb[23].mxu0 }
 0x185   : > { %v5092_v52 = vpack.c.bf16 %v2937_v24, %v2936_v28  ;;  %v2810_v18 = vadd.f32 %v6138_v0, %v2252_v44  ;;  %v6295_v28 = vpop.f32.mrb[40].mxu1 }
 0x186   : > { %v2939_v57 = vmax.f32 %v2811_v40, 0.0  ;;  %6836 = vst [vmem:[#allocation9_spill] sm:$0xff] %v6295_v28  ;;  %v6297_v44 = vpop.f32.mrb[41].mxu1 }
 0x187   : > { %v2938_v2 = vmax.f32 %v2810_v18, 0.0  ;;  %v4918_v7 = vpop.f32.mrb[24].mxu0  ;;  %6837 = vst [vmem:[#allocation10_spill] sm:$0xff] %v6297_v44 }
 0x188   : > { %v2813_v13 = vadd.f32 %v4918_v7, %v6138_v0  ;;  %v2262_v17 = vpop.f32.mrb[25].mxu0  ;;  %5091 = vmatpush3.bf16.xpose.msk.msra.mxu1 %vm6256_vm2, %v6171_v29 }
 0x189   : > { %v5098_v20 = vpack.c.bf16 %v2939_v57, %v2938_v2  ;;  %v2812_v22 = vadd.f32 %v6138_v0, %v2262_v17  ;;  %5094 = vmatprep.subr.msk.bf16.mxu1 %vm6256_vm2, %v5092_v52  ;;  %v6301_v57 = vpop.f32.mrb[42].mxu1 }
 0x18a   : > { %v2941_v24 = vmax.f32 %v2813_v13, 0.0  ;;  %6838 = vst [vmem:[#allocation11_spill] sm:$0xff] %v6301_v57  ;;  %v6303_v35 = vpop.f32.mrb[43].mxu1 }
 0x18b   : > { %v2940_v32 = vmax.f32 %v2812_v22, 0.0  ;;  %v4921_v40 = vpop.f32.mrb[26].mxu0  ;;  %6839 = vst [vmem:[#allocation12_spill] sm:$0xff] %v6303_v35 }
 0x18c   : > { %v2815_v18 = vadd.f32 %v4921_v40, %v6138_v0  ;;  %v2272_v7 = vpop.f32.mrb[27].mxu0 }
 0x18d   : > { %v5104_v8 = vpack.c.bf16 %v2941_v24, %v2940_v32  ;;  %v2814_v60 = vadd.f32 %v6138_v0, %v2272_v7  ;;  %v6312_v32 = vpop.f32.mrb[44].mxu1 }
 0x18e   : > { %v2943_v29 = vmax.f32 %v2815_v18, 0.0  ;;  %6840 = vst [vmem:[#allocation13_spill] sm:$0xff] %v6312_v32  ;;  %v6314_v7 = vpop.f32.mrb[45].mxu1 }
 0x18f   : > { %v2942_v2 = vmax.f32 %v2814_v60, 0.0  ;;  %v4924_v17 = vpop.f32.mrb[28].mxu0  ;;  %6841 = vst [vmem:[#allocation14_spill] sm:$0xff] %v6314_v7 }
 0x190   : > { %v2817_v52 = vadd.f32 %v4924_v17, %v6138_v0  ;;  %v2282_v13 = vpop.f32.mrb[29].mxu0  ;;  %5097 = vmatpush3.bf16.xpose.msk.msra.mxu1 %vm6256_vm2, %v6183_v45 }
 0x191   : > { %v5110_v22 = vpack.c.bf16 %v2943_v29, %v2942_v2  ;;  %v2816_v40 = vadd.f32 %v6138_v0, %v2282_v13  ;;  %5100 = vmatprep.subr.msk.bf16.mxu1 %vm6256_vm2, %v5098_v20  ;;  %v6318_v29 = vpop.f32.mrb[46].mxu1 }
 0x192   : > { %v2945_v24 = vmax.f32 %v2817_v52, 0.0  ;;  %6842 = vst [vmem:[#allocation15_spill] sm:$0xff] %v6318_v29  ;;  %v6320_v28 = vpop.f32.mrb[47].mxu1 }
 0x193   : > { %v2944_v60 = vmax.f32 %v2816_v40, 0.0  ;;  %v4927_v18 = vpop.f32.mrb[30].mxu0  ;;  %6843 = vst [vmem:[#allocation16_spill] sm:$0xff] %v6320_v28 }
 0x194   : > { %v2819_v17 = vadd.f32 %v4927_v18, %v6138_v0  ;;  %v2292_v35 = vpop.f32.mrb[31].mxu0 }
 0x195   : > { %v5116_v57 = vpack.c.bf16 %v2945_v24, %v2944_v60  ;;  %v2818_v44 = vadd.f32 %v6138_v0, %v2292_v35  ;;  %v6329_v24 = vpop.f32.mrb[48].mxu1 }
 0x196   : > { %v2947_v45 = vmax.f32 %v2819_v17, 0.0  ;;  %6844 = vst [vmem:[#allocation17_spill] sm:$0xff] %v6329_v24  ;;  %v6331_v17 = vpop.f32.mrb[49].mxu1 }
 0x197   : > { %v2946_v2 = vmax.f32 %v2818_v44, 0.0  ;;  %v4930_v13 = vpop.f32.mrb[32].mxu0  ;;  %6845 = vst [vmem:[#allocation18_spill] sm:$0xff] %v6331_v17 }
 0x198   : > { %v2821_v20 = vadd.f32 %v4930_v13, %v6138_v0  ;;  %v2302_v52 = vpop.f32.mrb[33].mxu0  ;;  %5103 = vmatpush3.bf16.xpose.msk.msra.mxu1 %vm6256_vm2, %v6195_v4 }
 0x199   : > { %v5122_v40 = vpack.c.bf16 %v2947_v45, %v2946_v2  ;;  %v2820_v18 = vadd.f32 %v6138_v0, %v2302_v52  ;;  %5106 = vmatprep.subr.msk.bf16.mxu1 %vm6256_vm2, %v5104_v8  ;;  %v6337_v2 = vpop.f32.mrb[50].mxu1 }
 0x19a   : > { %v2949_v35 = vmax.f32 %v2821_v20, 0.0  ;;  %6846 = vst [vmem:[#allocation19_spill] sm:$0xff] %v6337_v2  ;;  %v6339_v8 = vpop.f32.mrb[51].mxu1 }
 0x19b   : > { %v2948_v44 = vmax.f32 %v2820_v18, 0.0  ;;  %v4933_v60 = vpop.f32.mrb[34].mxu0  ;;  %6847 = vst [vmem:[#allocation20_spill] sm:$0xff] %v6339_v8 }
 0x19c   : > { %v2823_v13 = vadd.f32 %v4933_v60, %v6138_v0  ;;  %v2312_v28 = vpop.f32.mrb[35].mxu0 }
 0x19d   : > { %v6334_v29 = vpack.c.bf16 %v2949_v35, %v2948_v44  ;;  %v2822_v4 = vadd.f32 %v6138_v0, %v2312_v28  ;;  %v6350_v44 = vpop.f32.mrb[52].mxu1 }
 0x19e   : > { %v2951_v45 = vmax.f32 %v2823_v13, 0.0  ;;  %6848 = vst [vmem:[#allocation21_spill] sm:$0xff] %v6350_v44  ;;  %v6352_v8 = vpop.f32.mrb[53].mxu1 }
 0x19f   : > { %v2950_v52 = vmax.f32 %v2822_v4, 0.0  ;;  %v4936_v7 = vpop.f32.mrb[36].mxu0  ;;  %6849 = vst [vmem:[#allocation22_spill] sm:$0xff] %v6352_v8 }
 0x1a0   : > { %v2825_v20 = vadd.f32 %v4936_v7, %v6138_v0  ;;  %v2322_v18 = vpop.f32.mrb[37].mxu0  ;;  %5109 = vmatpush3.bf16.xpose.msk.msra.mxu1 %vm6256_vm2, %v6207_v19 }
 0x1a1   : > { %v6345_v60 = vpack.c.bf16 %v2951_v45, %v2950_v52  ;;  %v2824_v35 = vadd.f32 %v6138_v0, %v2322_v18  ;;  %5112 = vmatprep.subr.msk.bf16.mxu1 %vm6256_vm2, %v5110_v22  ;;  %v6358_v52 = vpop.f32.mrb[54].mxu1 }
 0x1a2   : > { %v2953_v28 = vmax.f32 %v2825_v20, 0.0  ;;  %6850 = vst [vmem:[#allocation23_spill] sm:$0xff] %v6358_v52  ;;  %v6360_v22 = vpop.f32.mrb[55].mxu1 }
 0x1a3   : > { %v2952_v13 = vmax.f32 %v2824_v35, 0.0  ;;  %v4939_v4 = vpop.f32.mrb[38].mxu0  ;;  %6851 = vst [vmem:[#allocation24_spill] sm:$0xff] %v6360_v22 }
 0x1a4   : > { %v2827_v7 = vadd.f32 %v4939_v4, %v6138_v0  ;;  %v2332_v2 = vpop.f32.mrb[39].mxu0 }
 0x1a5   : > { %v6355_v17 = vpack.c.bf16 %v2953_v28, %v2952_v13  ;;  %v2826_v19 = vadd.f32 %v6138_v0, %v2332_v2  ;;  %v6371_v13 = vpop.f32.mrb[56].mxu1 }
 0x1a6   : > { %v2955_v45 = vmax.f32 %v2827_v7, 0.0  ;;  %6852 = vst [vmem:[#allocation25_spill] sm:$0xff] %v6371_v13  ;;  %v6373_v22 = vpop.f32.mrb[57].mxu1 }
 0x1a7   : > { %v2954_v18 = vmax.f32 %v2826_v19, 0.0  ;;  %v4942_v24 = vpop.f32.mrb[40].mxu0  ;;  %6853 = vst [vmem:[#allocation26_spill] sm:$0xff] %v6373_v22 }
 0x1a8   : > { %v2829_v20 = vadd.f32 %v4942_v24, %v6138_v0  ;;  %v2342_v35 = vpop.f32.mrb[41].mxu0  ;;  %5115 = vmatpush3.bf16.xpose.msk.msra.mxu1 %vm6256_vm2, %v6219_v33 }
 0x1a9   : > { %v6366_v4 = vpack.c.bf16 %v2955_v45, %v2954_v18  ;;  %v2828_v28 = vadd.f32 %v6138_v0, %v2342_v35  ;;  %5118 = vmatprep.subr.msk.bf16.mxu1 %vm6256_vm2, %v5116_v57  ;;  %v6379_v18 = vpop.f32.mrb[58].mxu1 }
 0x1aa   : > { %v2957_v2 = vmax.f32 %v2829_v20, 0.0  ;;  %6854 = vst [vmem:[#allocation27_spill] sm:$0xff] %v6379_v18  ;;  %v6381_v57 = vpop.f32.mrb[59].mxu1 }
 0x1ab   : > { %v2956_v7 = vmax.f32 %v2828_v28, 0.0  ;;  %v4945_v19 = vpop.f32.mrb[42].mxu0  ;;  %6855 = vst [vmem:[#allocation28_spill] sm:$0xff] %v6381_v57 }
 0x1ac   : > { %v2831_v24 = vadd.f32 %v4945_v19, %v6138_v0  ;;  %v2352_v52 = vpop.f32.mrb[43].mxu0 }
 0x1ad   : > { %v6376_v8 = vpack.c.bf16 %v2957_v2, %v2956_v7  ;;  %v2830_v33 = vadd.f32 %v6138_v0, %v2352_v52  ;;  %v6392_v7 = vpop.f32.mrb[60].mxu1 }
 0x1ae   : > { %v2959_v45 = vmax.f32 %v2831_v24, 0.0  ;;  %6856 = vst [vmem:[#allocation29_spill] sm:$0xff] %v6392_v7  ;;  %v6394_v57 = vpop.f32.mrb[61].mxu1 }
 0x1af   : > { %v2958_v35 = vmax.f32 %v2830_v33, 0.0  ;;  %v4948_v44 = vpop.f32.mrb[44].mxu0  ;;  %6857 = vst [vmem:[#allocation30_spill] sm:$0xff] %v6394_v57 }
 0x1b0   : > { %v2833_v20 = vadd.f32 %v4948_v44, %v6138_v0  ;;  %v2362_v28 = vpop.f32.mrb[45].mxu0  ;;  %5121 = vmatpush3.bf16.xpose.msk.msra.mxu1 %vm6256_vm2, %v6231_v1 }
 0x1b1   : > { %v6387_v19 = vpack.c.bf16 %v2959_v45, %v2958_v35  ;;  %v2832_v2 = vadd.f32 %v6138_v0, %v2362_v28  ;;  %5124 = vmatprep.subr.msk.bf16.mxu1 %vm6256_vm2, %v5122_v40  ;;  %v6400_v35 = vpop.f32.mrb[62].mxu1 }
 0x1b2   : > { %v2961_v52 = vmax.f32 %v2833_v20, 0.0  ;;  %6858 = vst [vmem:[#allocation31_spill] sm:$0xff] %v6400_v35  ;;  %v6402_v40 = vpop.f32.mrb[63].mxu1 }
 0x1b3   : > { %v2960_v24 = vmax.f32 %v2832_v2, 0.0  ;;  %v4951_v33 = vpop.f32.mrb[46].mxu0  ;;  %6859 = vst [vmem:[#allocation32_spill] sm:$0xff] %v6402_v40  ;;  %v6414_v7 = vpop.f32.mrb[64].mxu1 }
 0x1b4   : > { %v2835_v44 = vadd.f32 %v4951_v33, %v6138_v0  ;;  %v2372_v18 = vpop.f32.mrb[47].mxu0 }
 0x1b5   : > { %v6397_v22 = vpack.c.bf16 %v2961_v52, %v2960_v24  ;;  %v2834_v1 = vadd.f32 %v6138_v0, %v2372_v18 }
 0x1b6   : > { %v2963_v45 = vmax.f32 %v2835_v44, 0.0 }
 0x1b7   : > { %v2962_v28 = vmax.f32 %v2834_v1, 0.0  ;;  %v4954_v13 = vpop.f32.mrb[48].mxu0 }
 0x1b8   : > { %v2837_v20 = vadd.f32 %v4954_v13, %v6138_v0  ;;  %v2382_v2 = vpop.f32.mrb[49].mxu0  ;;  %5127 = vmatpush3.bf16.xpose.msk.msra.mxu1 %vm6256_vm2, %v6243_v21 }
 0x1b9   : > { %v6408_v33 = vpack.c.bf16 %v2963_v45, %v2962_v28  ;;  %v2836_v52 = vadd.f32 %v6138_v0, %v2382_v2  ;;  %v6421_v45 = vpop.f32.mrb[65].mxu1 }
 0x1ba   : > { %v2965_v24 = vmax.f32 %v2837_v20, 0.0 }
 0x1bb   : > { %v2964_v18 = vmax.f32 %v2836_v52, 0.0  ;;  %v4957_v44 = vpop.f32.mrb[50].mxu0 }
 0x1bc   : > { %v2398_v35 = vadd.f32 %v4957_v44, %v6075_v37  ;;  %v2392_v1 = vpop.f32.mrb[51].mxu0 }
 0x1bd   : > { %v5128_v57 = vpack.c.bf16 %v2965_v24, %v2964_v18  ;;  %v2393_v40 = vadd.f32 %v2392_v1, %v6077_v38  ;;  %v6437_v1 = vpop.f32.mrb[66].mxu1 }
 0x1be   : > { %v2839_v13 = vadd.f32 %v6138_v0, %v2398_v35 }
 0x1bf   : > { %v2838_v32 = vadd.f32 %v6138_v0, %v2393_v40  ;;  %5130 = vmatprep.subr.msk.bf16.mxu1 %vm6256_vm2, %v5128_v57  ;;  %4577 = vmatmul.mubr.msk.f32.vlgmr.msra.gmra.mrb[78].mxu1 %vm3045_vm1, %v6086_v41  ;;  %v4960_v21 = vpop.f32.mrb[52].mxu0 }
 0x1c0   : > { %v2967_v37 = vmax.f32 %v2839_v13, 0.0  ;;  %5133 = vmatpush3.bf16.xpose.msk.msra.mxu1 %vm6256_vm2, %v6334_v29  ;;  %v2408_v38 = vadd.f32 %v4960_v21, %v6088_v42  ;;  %v2402_v35 = vpop.f32.mrb[53].mxu0  ;;  %4610 = vmatprep.mubr.msk.f32.mxu1 %vm3045_vm1, %v6086_v41 }
 0x1c1   : > { %v2966_v28 = vmax.f32 %v2838_v32, 0.0  ;;  %v2403_v57 = vadd.f32 %v2402_v35, %v6092_v43 }
 0x1c2   : > { %v2841_v40 = vadd.f32 %v6138_v0, %v2408_v38 }
 0x1c3   : > { %v5134_v20 = vpack.c.bf16 %v2967_v37, %v2966_v28  ;;  %v2840_v2 = vadd.f32 %v6138_v0, %v2403_v57  ;;  %v4963_v52 = vpop.f32.mrb[54].mxu0  ;;  %v6440_v37 = vpop.f32.mrb[67].mxu1 }
 0x1c4   : > { %v2969_v24 = vmax.f32 %v2841_v40, 0.0  ;;  %v2418_v18 = vadd.f32 %v4963_v52, %v6098_v46  ;;  %v2412_v44 = vpop.f32.mrb[55].mxu0 }
 0x1c5   : > { %v2968_v29 = vmax.f32 %v2840_v2, 0.0  ;;  %5136 = vmatprep.subr.msk.bf16.mxu1 %vm6256_vm2, %v5134_v20  ;;  %v2413_v42 = vadd.f32 %v2412_v44, %v6100_v47 }
 0x1c6   : > { %v2843_v32 = vadd.f32 %v6138_v0, %v2418_v18 }
 0x1c7   : > { %v5140_v43 = vpack.c.bf16 %v2969_v24, %v2968_v29  ;;  %v2842_v13 = vadd.f32 %v6138_v0, %v2413_v42  ;;  %v4966_v21 = vpop.f32.mrb[56].mxu0  ;;  %v6454_v29 = vpop.f32.mrb[68].mxu1 }
 0x1c8   : > { %5139 = vmatpush3.bf16.xpose.msk.msra.mxu1 %vm6256_vm2, %v6345_v60  ;;  %v2971_v46 = vmax.f32 %v2843_v32, 0.0  ;;  %v2428_v38 = vadd.f32 %v4966_v21, %v6106_v50  ;;  %v2422_v35 = vpop.f32.mrb[57].mxu0 }
 0x1c9   : > { %v2970_v28 = vmax.f32 %v2842_v13, 0.0  ;;  %5142 = vmatprep.subr.msk.bf16.mxu1 %vm6256_vm2, %v5140_v43  ;;  %v2423_v47 = vadd.f32 %v2422_v35, %v6108_v51  ;;  %v6457_v43 = vpop.f32.mrb[69].mxu1 }
 0x1ca   : > { %v2845_v57 = vadd.f32 %v6138_v0, %v2428_v38 }
 0x1cb   : > { %v5146_v40 = vpack.c.bf16 %v2971_v46, %v2970_v28  ;;  %v2844_v20 = vadd.f32 %v6138_v0, %v2423_v47  ;;  %v4969_v2 = vpop.f32.mrb[58].mxu0 }
 0x1cc   : > { %v2973_v52 = vmax.f32 %v2845_v57, 0.0  ;;  %v2438_v24 = vadd.f32 %v4969_v2, %v6114_v54  ;;  %v2432_v60 = vpop.f32.mrb[59].mxu0 }
 0x1cd   : > { %v2972_v18 = vmax.f32 %v2844_v20, 0.0  ;;  %v2433_v50 = vadd.f32 %v2432_v60, %v6116_v55 }
 0x1ce   : > { %v2847_v44 = vadd.f32 %v6138_v0, %v2438_v24  ;;  %v6471_v24 = vpop.f32.mrb[70].mxu1 }
 0x1cf   : > { %v5152_v42 = vpack.c.bf16 %v2973_v52, %v2972_v18  ;;  %v2846_v51 = vadd.f32 %v6138_v0, %v2433_v50  ;;  %v4972_v32 = vpop.f32.mrb[60].mxu0  ;;  %v6474_v18 = vpop.f32.mrb[71].mxu1 }
 0x1d0   : > { %5145 = vmatpush3.bf16.xpose.msk.msra.mxu1 %vm6256_vm2, %v6355_v17  ;;  %v2975_v13 = vmax.f32 %v2847_v44, 0.0  ;;  %v2448_v54 = vadd.f32 %v4972_v32, %v6122_v58  ;;  %v2442_v21 = vpop.f32.mrb[61].mxu0 }
 0x1d1   : > { %5148 = vmatprep.subr.msk.bf16.mxu1 %vm6256_vm2, %v5146_v40  ;;  %v2974_v55 = vmax.f32 %v2846_v51, 0.0  ;;  %v2443_v46 = vadd.f32 %v2442_v21, %v6124_v59 }
 0x1d2   : > { %v2849_v38 = vadd.f32 %v6138_v0, %v2448_v54 }
 0x1d3   : > { %v5158_v35 = vpack.c.bf16 %v2975_v13, %v2974_v55  ;;  %v2848_v28 = vadd.f32 %v6138_v0, %v2443_v46  ;;  %v4975_v47 = vpop.f32.mrb[62].mxu0 }
 0x1d4   : > { %v2977_v57 = vmax.f32 %v2849_v38, 0.0  ;;  %v2458_v20 = vadd.f32 %v4975_v47, %v6130_v62  ;;  %v2452_v17 = vpop.f32.mrb[63].mxu0 }
 0x1d5   : > { %v2976_v2 = vmax.f32 %v2848_v28, 0.0  ;;  %v2453_v58 = vadd.f32 %v2452_v17, %v6132_v63 }
 0x1d6   : > { %v2851_v52 = vadd.f32 %v6138_v0, %v2458_v20 }
 0x1d7   : > { %v5164_v40 = vpack.c.bf16 %v2977_v57, %v2976_v2  ;;  %v2850_v59 = vadd.f32 %v6138_v0, %v2453_v58  ;;  %v4978_v60 = vpop.f32.mrb[64].mxu0 }
 0x1d8   : > { %5151 = vmatpush3.bf16.xpose.msk.msra.mxu1 %vm6256_vm2, %v6366_v4  ;;  %v2979_v50 = vmax.f32 %v2851_v52, 0.0  ;;  %v2468_v62 = vadd.f32 %v4978_v60, %v6143_v3  ;;  %v2462_v44 = vpop.f32.mrb[65].mxu0 }
 0x1d9   : > { %5154 = vmatprep.subr.msk.bf16.mxu1 %vm6256_vm2, %v5152_v42  ;;  %v2978_v63 = vmax.f32 %v2850_v59, 0.0  ;;  %v2463_v51 = vadd.f32 %v2462_v44, %v6145_v5  ;;  %v6490_v42 = vpop.f32.mrb[72].mxu1 }
 0x1da   : > { %v2853_v32 = vadd.f32 %v6138_v0, %v2468_v62  ;;  %v6495_v20 = vpop.f32.mrb[73].mxu1 }
 0x1db   : > { %v6484_v13 = vpack.c.bf16 %v2979_v50, %v2978_v63  ;;  %v2852_v54 = vadd.f32 %v6138_v0, %v2463_v51  ;;  %v4981_v21 = vpop.f32.mrb[66].mxu0 }
 0x1dc   : > { %v2981_v55 = vmax.f32 %v2853_v32, 0.0  ;;  %v2478_v4 = vadd.f32 %v4981_v21, %v6153_v12  ;;  %v2472_v46 = vpop.f32.mrb[67].mxu0 }
 0x1dd   : > { %v2980_v38 = vmax.f32 %v2852_v54, 0.0  ;;  %v2473_v3 = vadd.f32 %v2472_v46, %v6155_v15 }
 0x1de   : > { %v2855_v28 = vadd.f32 %v6138_v0, %v2478_v4 }
 0x1df   : > { %v6492_v47 = vpack.c.bf16 %v2981_v55, %v2980_v38  ;;  %v2854_v5 = vadd.f32 %v6138_v0, %v2473_v3  ;;  %v4984_v57 = vpop.f32.mrb[68].mxu0 }
 0x1e0   : > { %5157 = vmatpush3.bf16.xpose.msk.msra.mxu1 %vm6256_vm2, %v6376_v8  ;;  %v2983_v12 = vmax.f32 %v2855_v28, 0.0  ;;  %v2488_v17 = vadd.f32 %v4984_v57, %v6165_v23  ;;  %v2482_v2 = vpop.f32.mrb[69].mxu0 }
 0x1e1   : > { %5160 = vmatprep.subr.msk.bf16.mxu1 %vm6256_vm2, %v5158_v35  ;;  %v2982_v15 = vmax.f32 %v2854_v5, 0.0  ;;  %v2483_v58 = vadd.f32 %v2482_v2, %v6167_v26  ;;  %v6511_v35 = vpop.f32.mrb[74].mxu1 }
 0x1e2   : > { %v2857_v52 = vadd.f32 %v6138_v0, %v2488_v17  ;;  %v6516_v21 = vpop.f32.mrb[75].mxu1 }
 0x1e3   : > { %v6505_v59 = vpack.c.bf16 %v2983_v12, %v2982_v15  ;;  %v2856_v60 = vadd.f32 %v6138_v0, %v2483_v58  ;;  %v4987_v50 = vpop.f32.mrb[70].mxu0  ;;  %v6532_v15 = vpop.f32.mrb[76].mxu1 }
 0x1e4   : > { %v2985_v62 = vmax.f32 %v2857_v52, 0.0  ;;  %v2498_v8 = vadd.f32 %v4987_v50, %v6177_v34  ;;  %v2492_v44 = vpop.f32.mrb[71].mxu0  ;;  %v6537_v52 = vpop.f32.mrb[77].mxu1 }
 0x1e5   : > { %v2984_v63 = vmax.f32 %v2856_v60, 0.0  ;;  %v2493_v23 = vadd.f32 %v2492_v44, %v6179_v39 }
 0x1e6   : > { %v2859_v51 = vadd.f32 %v6138_v0, %v2498_v8 }
 0x1e7   : > { %v6513_v32 = vpack.c.bf16 %v2985_v62, %v2984_v63  ;;  %v2858_v26 = vadd.f32 %v6138_v0, %v2493_v23  ;;  %v4990_v54 = vpop.f32.mrb[72].mxu0 }
 0x1e8   : > { %5163 = vmatpush3.bf16.xpose.msk.msra.mxu1 %vm6256_vm2, %v6387_v19  ;;  %v2987_v34 = vmax.f32 %v2859_v51, 0.0  ;;  %v2508_v55 = vadd.f32 %v4990_v54, %v6189_v56  ;;  %v2502_v4 = vpop.f32.mrb[73].mxu0 }
 0x1e9   : > { %v2986_v39 = vmax.f32 %v2858_v26, 0.0  ;;  %5166 = vmatprep.subr.msk.bf16.mxu1 %vm6256_vm2, %v5164_v40  ;;  %v2503_v46 = vadd.f32 %v2502_v4, %v6191_v61 }
 0x1ea   : > { %v2861_v38 = vadd.f32 %v6138_v0, %v2508_v55 }
 0x1eb   : > { %v6526_v3 = vpack.c.bf16 %v2987_v34, %v2986_v39  ;;  %v2860_v28 = vadd.f32 %v6138_v0, %v2503_v46  ;;  %v4993_v5 = vpop.f32.mrb[74].mxu0 }
 0x1ec   : > { %v2989_v57 = vmax.f32 %v2861_v38, 0.0  ;;  %v2518_v19 = vadd.f32 %v4993_v5, %v6201_v10  ;;  %v2512_v12 = vpop.f32.mrb[75].mxu0 }
 0x1ed   : > { %v2988_v17 = vmax.f32 %v2860_v28, 0.0  ;;  %v2513_v56 = vadd.f32 %v2512_v12, %v6203_v14 }
 0x1ee   : > { %v2863_v2 = vadd.f32 %v6138_v0, %v2518_v19 }
 0x1ef   : > { %v6534_v40 = vpack.c.bf16 %v2989_v57, %v2988_v17  ;;  %v2862_v61 = vadd.f32 %v6138_v0, %v2513_v56  ;;  %v4996_v58 = vpop.f32.mrb[76].mxu0 }
 0x1f0   : > { %5169 = vmatpush3.bf16.xpose.msk.msra.mxu1 %vm6256_vm2, %v6397_v22  ;;  %v2991_v10 = vmax.f32 %v2863_v2, 0.0  ;;  %v2528_v60 = vadd.f32 %v4996_v58, %v6213_v25  ;;  %v2522_v50 = vpop.f32.mrb[77].mxu0 }
 0x1f1   : > { %v2990_v14 = vmax.f32 %v2862_v61, 0.0  ;;  %v2523_v62 = vadd.f32 %v2522_v50, %v6215_v30  ;;  %5172 = vmatprep.subr.msk.bf16.mxu1 %vm6256_vm2, %v6484_v13 }
 0x1f2   : > { %v2865_v8 = vadd.f32 %v6138_v0, %v2528_v60 }
 0x1f3   : > { %v6548_v44 = vpack.c.bf16 %v2991_v10, %v2990_v14  ;;  %v2864_v63 = vadd.f32 %v6138_v0, %v2523_v62  ;;  %v4999_v23 = vpop.f32.mrb[78].mxu0 }
 0x1f4   : > { %v2993_v51 = vmax.f32 %v2865_v8, 0.0  ;;  %v2538_v22 = vadd.f32 %v4999_v23, %v6225_v48  ;;  %v2532_v26 = vpop.f32.mrb[79].mxu0 }
 0x1f5   : > { %v2992_v25 = vmax.f32 %v2864_v63, 0.0  ;;  %v2533_v54 = vadd.f32 %v2532_v26, %v6227_v53 }
 0x1f6   : > { %v2867_v30 = vadd.f32 %v6138_v0, %v2538_v22 }
 0x1f7   : > { %v6554_v34 = vpack.c.bf16 %v2993_v51, %v2992_v25  ;;  %v2866_v13 = vadd.f32 %v6138_v0, %v2533_v54  ;;  %v5002_v55 = vpop.f32.mrb[80].mxu0  ;;  %v6860_v51 = vld [vmem:[#allocation6_spill] sm:$0xff] }
 0x1f8   : > { %v2995_v4 = vmax.f32 %v2867_v30, 0.0  ;;  %v2548_v39 = vadd.f32 %v5002_v55, %v6237_v9  ;;  %v2542_v46 = vpop.f32.mrb[81].mxu0  ;;  %5175 = vmatpush3.bf16.xpose.msk.msra.mxu1 %vm6256_vm2, %v6408_v33  ;;  %v6861_v30 = vld [vmem:[#allocation7_spill] sm:$0xff] }
 0x1f9   : > { %v2994_v48 = vmax.f32 %v2866_v13, 0.0  ;;  %v2543_v38 = vadd.f32 %v2542_v46, %v6239_v16 }
 0x1fa   : > { %v2869_v53 = vadd.f32 %v6138_v0, %v2548_v39  ;;  %v6862_v39 = vld [vmem:[#allocation8_spill] sm:$0xff] }
 0x1fb   : > { %v6563_v28 = vpack.c.bf16 %v2995_v4, %v2994_v48  ;;  %v2868_v5 = vadd.f32 %v6138_v0, %v2543_v38  ;;  %v5005_v57 = vpop.f32.mrb[82].mxu0 }
 0x1fc   : > { %v2997_v19 = vmax.f32 %v2869_v53, 0.0  ;;  %v2558_v12 = vadd.f32 %v5005_v57, %v6249_v31  ;;  %v2552_v17 = vpop.f32.mrb[83].mxu0  ;;  %v6863_v57 = vld [vmem:[#allocation9_spill] sm:$0xff] }
 0x1fd   : > { %v2996_v9 = vmax.f32 %v2868_v5, 0.0  ;;  %v2553_v56 = vadd.f32 %v2552_v17, %v6251_v36 }
 0x1fe   : > { %v2871_v2 = vadd.f32 %v6138_v0, %v2558_v12 }
 0x1ff   : > { %v5176_v33 = vpack.c.bf16 %v2997_v19, %v2996_v9  ;;  %v2870_v61 = vadd.f32 %v6138_v0, %v2553_v56  ;;  %4611 = vmatmul.mubr.msk.f32.vlgmr.msra.gmra.mrb[80].mxu1 %vm3045_vm1, %v6086_v41  ;;  %v5008_v16 = vpop.f32.mrb[84].mxu0  ;;  %v6864_v9 = vld [vmem:[#allocation10_spill] sm:$0xff] }
 0x200   : > { %v2999_v58 = vmax.f32 %v2871_v2, 0.0  ;;  %v2568_v10 = vadd.f32 %v5008_v16, %v6264_v6  ;;  %v2562_v60 = vpop.f32.mrb[85].mxu0  ;;  %4644 = vmatprep.mubr.msk.f32.mxu1 %vm3045_vm1, %v6086_v41 }
 0x201   : > { %v2998_v31 = vmax.f32 %v2870_v61, 0.0  ;;  %5178 = vmatprep.subr.msk.bf16.mxu1 %vm6256_vm2, %v5176_v33  ;;  %v2563_v36 = vadd.f32 %v2562_v60, %v6268_v11 }
 0x202   : > { %5181 = vmatpush3.bf16.xpose.msk.msra.mxu1 %vm6256_vm2, %v6492_v47  ;;  %v2873_v50 = vadd.f32 %v6138_v0, %v2568_v10 }
 0x203   : > { %v5182_v14 = vpack.c.bf16 %v2999_v58, %v2998_v31  ;;  %v2872_v62 = vadd.f32 %v6138_v0, %v2563_v36  ;;  %v5011_v6 = vpop.f32.mrb[86].mxu0  ;;  %v6865_v58 = vld [vmem:[#allocation11_spill] sm:$0xff]  ;;  %v6866_v36 = vld [vmem:[#allocation12_spill] sm:$0xff] }
 0x204   : > { %v3001_v8 = vmax.f32 %v2873_v50, 0.0  ;;  %v2578_v63 = vadd.f32 %v5011_v6, %v6276_v27  ;;  %v2572_v41 = vpop.f32.mrb[87].mxu0 }
 0x205   : > { %v3000_v23 = vmax.f32 %v2872_v62, 0.0  ;;  %5184 = vmatprep.subr.msk.bf16.mxu1 %vm6256_vm2, %v5182_v14  ;;  %v2573_v11 = vadd.f32 %v2572_v41, %v6860_v51  ;;  %v6610_v14 = vld [vmem:[%s6825_s4] ss:$0 sm:$0xff]  ;;  %v6867_v41 = vld [vmem:[#allocation13_spill] sm:$0xff] }
 0x206   : > { %v2875_v22 = vadd.f32 %v6138_v0, %v2578_v63 }
 0x207   : > { %v5188_v26 = vpack.c.bf16 %v3001_v8, %v3000_v23  ;;  %v2874_v47 = vadd.f32 %v6138_v0, %v2573_v11  ;;  %v5014_v25 = vpop.f32.mrb[88].mxu0 }
 0x208   : > { %v3003_v54 = vmax.f32 %v2875_v22, 0.0  ;;  %v2588_v13 = vadd.f32 %v5014_v25, %v6861_v30  ;;  %v2582_v55 = vpop.f32.mrb[89].mxu0 }
 0x209   : > { %v3002_v4 = vmax.f32 %v2874_v47, 0.0  ;;  %v2583_v27 = vadd.f32 %v2582_v55, %v6862_v39 }
 0x20a   : > { %5187 = vmatpush3.bf16.xpose.msk.msra.mxu1 %vm6256_vm2, %v6505_v59  ;;  %v2877_v46 = vadd.f32 %v6138_v0, %v2588_v13  ;;  %v6869_v13 = vld [vmem:[#allocation15_spill] sm:$0xff] }
 0x20b   : > { %v5194_v48 = vpack.c.bf16 %v3003_v54, %v3002_v4  ;;  %5190 = vmatprep.subr.msk.bf16.mxu1 %vm6256_vm2, %v5188_v26  ;;  %v2876_v38 = vadd.f32 %v6138_v0, %v2583_v27  ;;  %v5017_v53 = vpop.f32.mrb[90].mxu0  ;;  %v6870_v27 = vld [vmem:[#allocation16_spill] sm:$0xff] }
 0x20c   : > { %v3005_v5 = vmax.f32 %v2877_v46, 0.0  ;;  %v2598_v19 = vadd.f32 %v5017_v53, %v6863_v57  ;;  %v2592_v12 = vpop.f32.mrb[91].mxu0 }
 0x20d   : > { %v3004_v17 = vmax.f32 %v2876_v38, 0.0  ;;  %v2593_v56 = vadd.f32 %v2592_v12, %v6864_v9 }
 0x20e   : > { %v2879_v2 = vadd.f32 %v6138_v0, %v2598_v19  ;;  %v6871_v19 = vld [vmem:[#allocation17_spill] sm:$0xff] }
 0x20f   : > { %v5200_v33 = vpack.c.bf16 %v3005_v5, %v3004_v17  ;;  %v2878_v59 = vadd.f32 %v6138_v0, %v2593_v56  ;;  %v5020_v61 = vpop.f32.mrb[92].mxu0  ;;  %v6872_v56 = vld [vmem:[#allocation18_spill] sm:$0xff] }
 0x210   : > { %v3007_v16 = vmax.f32 %v2879_v2, 0.0  ;;  %v2608_v10 = vadd.f32 %v5020_v61, %v6865_v58  ;;  %v2602_v60 = vpop.f32.mrb[93].mxu0 }
 0x211   : > { %v3006_v31 = vmax.f32 %v2878_v59, 0.0  ;;  %v2603_v50 = vadd.f32 %v2602_v60, %v6866_v36  ;;  %v6874_v36 = vld [vmem:[#allocation20_spill] sm:$0xff] }
 0x212   : > { %5193 = vmatpush3.bf16.xpose.msk.msra.mxu1 %vm6256_vm2, %v6513_v32  ;;  %v2881_v62 = vadd.f32 %v6610_v14, %v2608_v10  ;;  %v6868_v32 = vld [vmem:[#allocation14_spill] sm:$0xff] }
 0x213   : > { %5196 = vmatprep.subr.msk.bf16.mxu1 %vm6256_vm2, %v5194_v48  ;;  %v5206_v0 = vpack.c.bf16 %v3007_v16, %v3006_v31  ;;  %v2880_v6 = vadd.f32 %v6610_v14, %v2603_v50  ;;  %v5023_v8 = vpop.f32.mrb[94].mxu0 }
 0x214   : > { %v3009_v63 = vmax.f32 %v2881_v62, 0.0  ;;  %v2618_v23 = vadd.f32 %v5023_v8, %v6867_v41  ;;  %v2612_v51 = vpop.f32.mrb[95].mxu0 }
 0x215   : > { %v3008_v11 = vmax.f32 %v2880_v6, 0.0  ;;  %v2613_v22 = vadd.f32 %v2612_v51, %v6868_v32 }
 0x216   : > { %v2883_v26 = vadd.f32 %v6610_v14, %v2618_v23  ;;  %v6875_v23 = vld [vmem:[#allocation21_spill] sm:$0xff] }
 0x217   : > { %v5212_v47 = vpack.c.bf16 %v3009_v63, %v3008_v11  ;;  %v2882_v25 = vadd.f32 %v6610_v14, %v2613_v22  ;;  %v5026_v54 = vpop.f32.mrb[96].mxu0  ;;  %v6876_v22 = vld [vmem:[#allocation22_spill] sm:$0xff] }
 0x218   : > { %v3011_v30 = vmax.f32 %v2883_v26, 0.0  ;;  %v2628_v55 = vadd.f32 %v5026_v54, %v6869_v13  ;;  %v2622_v4 = vpop.f32.mrb[97].mxu0  ;;  %v6877_v13 = vld [vmem:[#allocation23_spill] sm:$0xff] }
 0x219   : > { %v3010_v39 = vmax.f32 %v2882_v25, 0.0  ;;  %v2623_v46 = vadd.f32 %v2622_v4, %v6870_v27  ;;  %v6878_v27 = vld [vmem:[#allocation24_spill] sm:$0xff] }
 0x21a   : > { %5199 = vmatpush3.bf16.xpose.msk.msra.mxu1 %vm6256_vm2, %v6526_v3  ;;  %v2885_v48 = vadd.f32 %v6610_v14, %v2628_v55 }
 0x21b   : > { %5202 = vmatprep.subr.msk.bf16.mxu1 %vm6256_vm2, %v5200_v33  ;;  %v5218_v38 = vpack.c.bf16 %v3011_v30, %v3010_v39  ;;  %v2884_v53 = vadd.f32 %v6610_v14, %v2623_v46  ;;  %v5029_v5 = vpop.f32.mrb[98].mxu0  ;;  %v6873_v33 = vld [vmem:[#allocation19_spill] sm:$0xff] }
 0x21c   : > { %v3013_v57 = vmax.f32 %v2885_v48, 0.0  ;;  %v2638_v12 = vadd.f32 %v5029_v5, %v6871_v19  ;;  %v2632_v17 = vpop.f32.mrb[99].mxu0 }
 0x21d   : > { %v3012_v9 = vmax.f32 %v2884_v53, 0.0  ;;  %v2633_v2 = vadd.f32 %v2632_v17, %v6872_v56 }
 0x21e   : > { %v2887_v59 = vadd.f32 %v6610_v14, %v2638_v12  ;;  %v6879_v12 = vld [vmem:[#allocation25_spill] sm:$0xff] }
 0x21f   : > { %v6632_v61 = vpack.c.bf16 %v3013_v57, %v3012_v9  ;;  %v2886_v3 = vadd.f32 %v6610_v14, %v2633_v2  ;;  %v5032_v16 = vpop.f32.mrb[100].mxu0  ;;  %v6880_v2 = vld [vmem:[#allocation26_spill] sm:$0xff] }
 0x220   : > { %v3015_v58 = vmax.f32 %v2887_v59, 0.0  ;;  %v2648_v10 = vadd.f32 %v5032_v16, %v6873_v33  ;;  %v2642_v60 = vpop.f32.mrb[101].mxu0 }
 0x221   : > { %v3014_v31 = vmax.f32 %v2886_v3, 0.0  ;;  %v2643_v50 = vadd.f32 %v2642_v60, %v6874_v36 }
 0x222   : > { %5205 = vmatpush3.bf16.xpose.msk.msra.mxu1 %vm6256_vm2, %v6534_v40  ;;  %v2889_v62 = vadd.f32 %v6610_v14, %v2648_v10  ;;  %v6881_v10 = vld [vmem:[#allocation27_spill] sm:$0xff] }
 0x223   : > { %5208 = vmatprep.subr.msk.bf16.mxu1 %vm6256_vm2, %v5206_v0  ;;  %v6643_v6 = vpack.c.bf16 %v3015_v58, %v3014_v31  ;;  %v2888_v8 = vadd.f32 %v6610_v14, %v2643_v50  ;;  %v5035_v63 = vpop.f32.mrb[102].mxu0 }
 0x224   : > { %v3017_v41 = vmax.f32 %v2889_v62, 0.0  ;;  %v2658_v51 = vadd.f32 %v5035_v63, %v6875_v23  ;;  %v2652_v11 = vpop.f32.mrb[103].mxu0 }
 0x225   : > { %v3016_v32 = vmax.f32 %v2888_v8, 0.0  ;;  %v2653_v26 = vadd.f32 %v2652_v11, %v6876_v22 }
 0x226   : > { %v2891_v25 = vadd.f32 %v6610_v14, %v2658_v51  ;;  %v6883_v51 = vld [vmem:[#allocation29_spill] sm:$0xff] }
 0x227   : > { %v6649_v40 = vpack.c.bf16 %v3017_v41, %v3016_v32  ;;  %v2890_v54 = vadd.f32 %v6610_v14, %v2653_v26  ;;  %v5038_v30 = vpop.f32.mrb[104].mxu0  ;;  %v6884_v26 = vld [vmem:[#allocation30_spill] sm:$0xff] }
 0x228   : > { %v3019_v0 = vmax.f32 %v2891_v25, 0.0  ;;  %v2668_v55 = vadd.f32 %v5038_v30, %v6877_v13  ;;  %v2662_v4 = vpop.f32.mrb[105].mxu0 }
 0x229   : > { %v3018_v39 = vmax.f32 %v2890_v54, 0.0  ;;  %v2663_v46 = vadd.f32 %v2662_v4, %v6878_v27 }
 0x22a   : > { %5211 = vmatpush3.bf16.xpose.msk.msra.mxu1 %vm6256_vm2, %v6548_v44  ;;  %v2893_v48 = vadd.f32 %v6610_v14, %v2668_v55  ;;  %v6885_v55 = vld [vmem:[#allocation31_spill] sm:$0xff] }
 0x22b   : > { %v6658_v53 = vpack.c.bf16 %v3019_v0, %v3018_v39  ;;  %v2892_v5 = vadd.f32 %v6610_v14, %v2663_v46  ;;  %v5041_v57 = vpop.f32.mrb[106].mxu0  ;;  %5214 = vmatprep.subr.msk.bf16.mxu1 %vm6256_vm2, %v5212_v47  ;;  %v6882_v47 = vld [vmem:[#allocation28_spill] sm:$0xff] }
 0x22c   : > { %v3021_v19 = vmax.f32 %v2893_v48, 0.0  ;;  %v2678_v17 = vadd.f32 %v5041_v57, %v6879_v12  ;;  %v2672_v9 = vpop.f32.mrb[107].mxu0 }
 0x22d   : > { %v3020_v56 = vmax.f32 %v2892_v5, 0.0  ;;  %v2673_v59 = vadd.f32 %v2672_v9, %v6880_v2 }
 0x22e   : > { %v2895_v3 = vadd.f32 %v6610_v14, %v2678_v17 }
 0x22f   : > { %v6666_v44 = vpack.c.bf16 %v3021_v19, %v3020_v56  ;;  %v2894_v16 = vadd.f32 %v6610_v14, %v2673_v59  ;;  %v5044_v58 = vpop.f32.mrb[108].mxu0 }
 0x230   : > { %v3023_v33 = vmax.f32 %v2895_v3, 0.0  ;;  %v2688_v60 = vadd.f32 %v5044_v58, %v6881_v10  ;;  %v2682_v31 = vpop.f32.mrb[109].mxu0 }
 0x231   : > { %v3022_v36 = vmax.f32 %v2894_v16, 0.0  ;;  %v2683_v50 = vadd.f32 %v2682_v31, %v6882_v47 }
 0x232   : > { %5217 = vmatpush3.bf16.xpose.msk.msra.mxu1 %vm6256_vm2, %v6554_v34  ;;  %v2897_v62 = vadd.f32 %v6610_v14, %v2688_v60 }
 0x233   : > { %v6675_v8 = vpack.c.bf16 %v3023_v33, %v3022_v36  ;;  %v2896_v63 = vadd.f32 %v6610_v14, %v2683_v50  ;;  %v5047_v41 = vpop.f32.mrb[110].mxu0  ;;  %5220 = vmatprep.subr.msk.bf16.mxu1 %vm6256_vm2, %v5218_v38  ;;  %v6886_v38 = vld [vmem:[#allocation32_spill] sm:$0xff] }
 0x234   : > { %v3025_v23 = vmax.f32 %v2897_v62, 0.0  ;;  %v2698_v11 = vadd.f32 %v5047_v41, %v6883_v51  ;;  %v2692_v32 = vpop.f32.mrb[111].mxu0 }
 0x235   : > { %v3024_v22 = vmax.f32 %v2896_v63, 0.0  ;;  %v2693_v25 = vadd.f32 %v2692_v32, %v6884_v26 }
 0x236   : > { %v2899_v54 = vadd.f32 %v6610_v14, %v2698_v11 }
 0x237   : > { %v6683_v34 = vpack.c.bf16 %v3025_v23, %v3024_v22  ;;  %v2898_v30 = vadd.f32 %v6610_v14, %v2693_v25  ;;  %v5050_v0 = vpop.f32.mrb[112].mxu0 }
 0x238   : > { %v3027_v13 = vmax.f32 %v2899_v54, 0.0  ;;  %v2708_v4 = vadd.f32 %v5050_v0, %v6885_v55  ;;  %v2702_v39 = vpop.f32.mrb[113].mxu0 }
 0x239   : > { %v3026_v27 = vmax.f32 %v2898_v30, 0.0  ;;  %v2703_v46 = vadd.f32 %v2702_v39, %v6886_v38 }
 0x23a   : > { %v2901_v48 = vadd.f32 %v6610_v14, %v2708_v4  ;;  %5223 = vmatpush3.bf16.xpose.msk.msra.mxu1 %vm6256_vm2, %v6563_v28 }
 0x23b   : > { %v6692_v5 = vpack.c.bf16 %v3027_v13, %v3026_v27  ;;  %v2900_v57 = vadd.f32 %v6610_v14, %v2703_v46  ;;  %v5053_v19 = vpop.f32.mrb[114].mxu0 }
 0x23c   : > { %v3029_v12 = vmax.f32 %v2901_v48, 0.0  ;;  %v2718_v17 = vadd.f32 %v5053_v19, %v6414_v7  ;;  %v2712_v9 = vpop.f32.mrb[115].mxu0  ;;  %v6705_v7 = vld [vmem:[%s6826_s5] sm:$0xff] }
 0x23d   : > { %v3028_v56 = vmax.f32 %v2900_v57, 0.0  ;;  %v2713_v2 = vadd.f32 %v2712_v9, %v6421_v45 }
 0x23e   : > { %v2903_v59 = vadd.f32 %v6610_v14, %v2718_v17 }
 0x23f   : > { %v5224_v3 = vpack.c.bf16 %v3029_v12, %v3028_v56  ;;  %v2902_v16 = vadd.f32 %v6610_v14, %v2713_v2  ;;  %v5056_v58 = vpop.f32.mrb[116].mxu0 }
 0x240   : > { %v3031_v33 = vmax.f32 %v2903_v59, 0.0  ;;  %v2728_v28 = vadd.f32 %v5056_v58, %v6437_v1  ;;  %v2722_v10 = vpop.f32.mrb[117].mxu0 }
 0x241   : > { %v3030_v60 = vmax.f32 %v2902_v16, 0.0  ;;  %5226 = vmatprep.subr.msk.bf16.mxu1 %vm6256_vm2, %v5224_v3  ;;  %4645 = vmatmul.mubr.msk.f32.vlgmr.msra.gmra.mrb[82].mxu1 %vm3045_vm1, %v6705_v7  ;;  %v2723_v45 = vadd.f32 %v2722_v10, %v6440_v37 }
 0x242   : > { %5229 = vmatpush3.bf16.xpose.msk.msra.mxu1 %vm6256_vm2, %v6632_v61  ;;  %v2905_v1 = vadd.f32 %v6610_v14, %v2728_v28  ;;  %4678 = vmatprep.mubr.msk.f32.mxu1 %vm3045_vm1, %v6705_v7 }
 0x243   : > { %v5230_v31 = vpack.c.bf16 %v3031_v33, %v3030_v60  ;;  %v2904_v36 = vadd.f32 %v6610_v14, %v2723_v45  ;;  %v5059_v47 = vpop.f32.mrb[118].mxu0 }
 0x244   : > { %v3033_v50 = vmax.f32 %v2905_v1, 0.0  ;;  %v2738_v62 = vadd.f32 %v5059_v47, %v6454_v29  ;;  %v2732_v63 = vpop.f32.mrb[119].mxu0  ;;  %v3750_v1 = vlaneseq }
 0x245   : > { %v3032_v41 = vmax.f32 %v2904_v36, 0.0  ;;  %5232 = vmatprep.subr.msk.bf16.mxu1 %vm6256_vm2, %v5230_v31  ;;  %v2733_v37 = vadd.f32 %v2732_v63, %v6457_v43 }
 0x246   : > { %v2907_v61 = vadd.f32 %v6610_v14, %v2738_v62  ;;  %v3751_v36 = vshrl.u32 %v3750_v1, 7 }
 0x247   : > { %v5236_v23 = vpack.c.bf16 %v3033_v50, %v3032_v41  ;;  %v2906_v51 = vadd.f32 %v6610_v14, %v2733_v37  ;;  %v5062_v11 = vpop.f32.mrb[120].mxu0 }
 0x248   : > { %v3035_v32 = vmax.f32 %v2907_v61, 0.0  ;;  %v2748_v22 = vadd.f32 %v5062_v11, %v6471_v24  ;;  %v2742_v26 = vpop.f32.mrb[121].mxu0 }
 0x249   : > { %v3034_v25 = vmax.f32 %v2906_v51, 0.0  ;;  %v2743_v29 = vadd.f32 %v2742_v26, %v6474_v18 }
 0x24a   : > { %5235 = vmatpush3.bf16.xpose.msk.msra.mxu1 %vm6256_vm2, %v6643_v6  ;;  %v2909_v54 = vadd.f32 %v6610_v14, %v2748_v22 }
 0x24b   : > { %v5242_v43 = vpack.c.bf16 %v3035_v32, %v3034_v25  ;;  %5238 = vmatprep.subr.msk.bf16.mxu1 %vm6256_vm2, %v5236_v23  ;;  %v2908_v30 = vadd.f32 %v6610_v14, %v2743_v29  ;;  %v5065_v0 = vpop.f32.mrb[122].mxu0 }
 0x24c   : > { %v3037_v13 = vmax.f32 %v2909_v54, 0.0  ;;  %v2758_v24 = vadd.f32 %v5065_v0, %v6490_v42  ;;  %v2752_v55 = vpop.f32.mrb[123].mxu0 }
 0x24d   : > { %v3036_v4 = vmax.f32 %v2908_v30, 0.0  ;;  %v2753_v18 = vadd.f32 %v2752_v55, %v6495_v20 }
 0x24e   : > { %v2911_v39 = vadd.f32 %v6610_v14, %v2758_v24 }
 0x24f   : > { %v5248_v27 = vpack.c.bf16 %v3037_v13, %v3036_v4  ;;  %v2910_v6 = vadd.f32 %v6610_v14, %v2753_v18  ;;  %v5068_v38 = vpop.f32.mrb[124].mxu0 }
 0x250   : > { %v3039_v46 = vmax.f32 %v2911_v39, 0.0  ;;  %v2768_v48 = vadd.f32 %v5068_v38, %v6511_v35  ;;  %v2762_v57 = vpop.f32.mrb[125].mxu0 }
 0x251   : > { %v3038_v19 = vmax.f32 %v2910_v6, 0.0  ;;  %v2763_v12 = vadd.f32 %v2762_v57, %v6516_v21 }
 0x252   : > { %5241 = vmatpush3.bf16.xpose.msk.msra.mxu1 %vm6256_vm2, %v6649_v40  ;;  %v2913_v42 = vadd.f32 %v6610_v14, %v2768_v48 }
 0x253   : > { %5244 = vmatprep.subr.msk.bf16.mxu1 %vm6256_vm2, %v5242_v43  ;;  %v5254_v20 = vpack.c.bf16 %v3039_v46, %v3038_v19  ;;  %v2912_v17 = vadd.f32 %v6610_v14, %v2763_v12  ;;  %v5071_v9 = vpop.f32.mrb[126].mxu0 }
 0x254   : > { %v3041_v56 = vmax.f32 %v2913_v42, 0.0  ;;  %v2778_v35 = vadd.f32 %v5071_v9, %v6532_v15  ;;  %v2772_v2 = vpop.f32.mrb[127].mxu0  ;;  %v3718_v15 = vstv %s3717_s24 }
 0x255   : > { %v3040_v59 = vmax.f32 %v2912_v17, 0.0  ;;  %v2773_v21 = vadd.f32 %v2772_v2, %v6537_v52 }
 0x256   : > { %v2915_v3 = vadd.f32 %v6610_v14, %v2778_v35 }
 0x257   : > { %v5260_v16 = vpack.c.bf16 %v3041_v56, %v3040_v59  ;;  %v2914_v40 = vadd.f32 %v6610_v14, %v2773_v21 }
 0x258   : > { %v3043_v58 = vmax.f32 %v2915_v3, 0.0 }
 0x259   : > { %v3042_v33 = vmax.f32 %v2914_v40, 0.0 }
 0x25a   : > { %5247 = vmatpush3.bf16.xpose.msk.msra.mxu1 %vm6256_vm2, %v6658_v53 }
 0x25b   : > { %5250 = vmatprep.subr.msk.bf16.mxu1 %vm6256_vm2, %v5248_v27  ;;  %v5266_v28 = vpack.c.bf16 %v3043_v58, %v3042_v33 }
 0x262   : > { %5253 = vmatpush3.bf16.xpose.msk.msra.mxu1 %vm6256_vm2, %v6666_v44 }
 0x263   : > { %5256 = vmatprep.subr.msk.bf16.mxu1 %vm6256_vm2, %v5254_v20 }
 0x26a   : > { %5259 = vmatpush3.bf16.xpose.msk.msra.mxu1 %vm6256_vm2, %v6675_v8 }
 0x26b   : > { %5262 = vmatprep.subr.msk.bf16.mxu1 %vm6256_vm2, %v5260_v16 }
 0x272   : > { %5265 = vmatpush3.bf16.xpose.msk.msra.mxu1 %vm6256_vm2, %v6683_v34  ;;  %v5508_v34 = vmov 1966171168  }
 0x273   : > { %5268 = vmatprep.subr.msk.bf16.mxu1 %vm6256_vm2, %v5266_v28  ;;  %v3748_v45 = vunpack.c.l.s4 %v5508_v34 }
 0x275   : > { %v3749_v31 = vunpack.c.0.s8 %v3748_v45 }
 0x27a   : > { %5271 = vmatpush3.bf16.xpose.msk.msra.mxu1 %vm6256_vm2, %v6692_v5 }
 0x281   : > { %4679 = vmatmul.mubr.msk.f32.vlgmr.msra.gmra.mrb[84].mxu1 %vm3045_vm1, %v6705_v7  ;;  %v3752_v7 = vsub.s32 %v3749_v31, %v3751_v36 }
 0x292   : > { %v3499_v52 = vpop.f32.mrb[78].mxu1 }
 0x293   : > { %v3719_v14 = vadd.f32 %v3718_v15, %v3499_v52  ;;  %v3501_v53 = vpop.f32.mrb[79].mxu1 }
 0x294   : > { %v3720_v44 = vadd.f32 %v3718_v15, %v3501_v53 }
 0x295   : > { %v3727_v8 = vmax.f32 %v3719_v14, 0.0 }
 0x296   : > { %v3728_v10 = vmax.f32 %v3720_v44, 0.0 }
 0x298   : > { %v3743_v60 = vcombine.low %v3727_v8, %v3728_v10 }
 0x29a   : > { %v3753_v37 = vrot.slane %v3743_v60, %v3752_v7 }
 0x2d2   : > { %v3570_v47 = vpop.f32.mrb[80].mxu1 }
 0x2d3   : > { %v3721_v49 = vadd.f32 %v3718_v15, %v3570_v47  ;;  %v3572_v5 = vpop.f32.mrb[81].mxu1 }
 0x2d4   : > { %v3722_v50 = vadd.f32 %v3718_v15, %v3572_v5 }
 0x2d5   : > { %v3729_v62 = vmax.f32 %v3721_v49, 0.0 }
 0x2d6   : > { %v3730_v63 = vmax.f32 %v3722_v50, 0.0 }
 0x2d8   : > { %v3744_v41 = vcombine.low %v3729_v62, %v3730_v63 }
 0x2da   : > { %v3760_v61 = vrot.slane %v3744_v41, %v3752_v7 }
 0x2dc   : > { %v3775_v23 = vcombine.low %v3753_v37, %v3760_v61 }
 0x2de   : > { %v3783_v27 = vrot.slane %v3775_v23, %v3752_v7 }
 0x314   : > { %v3641_v51 = vpop.f32.mrb[82].mxu1 }
 0x315   : > { %v3723_v11 = vadd.f32 %v3718_v15, %v3641_v51  ;;  %v3643_v32 = vpop.f32.mrb[83].mxu1 }
 0x316   : > { %v3724_v22 = vadd.f32 %v3718_v15, %v3643_v32 }
 0x317   : > { %v3731_v26 = vmax.f32 %v3723_v11, 0.0 }
 0x318   : > { %v3732_v25 = vmax.f32 %v3724_v22, 0.0 }
 0x31a   : > { %v3745_v29 = vcombine.low %v3731_v26, %v3732_v25 }
 0x31c   : > { %v3767_v4 = vrot.slane %v3745_v29, %v3752_v7 }
 0x354   : > { %v3712_v54 = vpop.f32.mrb[84].mxu1 }
 0x355   : > { %v3725_v43 = vadd.f32 %v3718_v15, %v3712_v54  ;;  %v3714_v30 = vpop.f32.mrb[85].mxu1 }
 0x356   : > { %v3726_v0 = vadd.f32 %v3718_v15, %v3714_v30 }
 0x357   : > { %v3733_v13 = vmax.f32 %v3725_v43, 0.0 }
 0x358   : > { %v3734_v24 = vmax.f32 %v3726_v0, 0.0 }
 0x35a   : > { %v3746_v55 = vcombine.low %v3733_v13, %v3734_v24 }
 0x35c   : > { %v3774_v18 = vrot.slane %v3746_v55, %v3752_v7 }
 0x35e   : > { %v3776_v39 = vcombine.low %v3767_v4, %v3774_v18 }
 0x360   : > { %v3790_v6 = vrot.slane %v3776_v39, %v3752_v7 }
 0x362   : > { %v3791_v38 = vcombine.low %v3783_v27, %v3790_v6 }
 0x364   : > { %3793 = vst [vmem:[%s313_s30] sm:$0xff] %v3791_v38 }
 0x365   : > { %5457 = shalt.err (!%p5454_p3)
}
 0x366   : > { %s5458_s18 = scalar_lea.hbm %s6779_s15, 128  ;;  %s5462_s24 = scalar_lea.hbm %s6828_s7, 384 }
 0x367   : > { %p5459_p4 = scmp.ne.s32.totalorder %s6779_s15, %s5458_s18  ;;  %p5463_p9 = scmp.lt.u32.totalorder %s6779_s15, %s6828_s7 }
 0x368   : > { %p5464_p10 = scmp.lt.u32.totalorder %s5462_s24, %s5458_s18  ;;  %p5466_p12 = scmp.lt.u32.totalorder %s5458_s18, %s6779_s15 }
 0x369   : > { %p5460_p7 = pnand %p5459_p4, %p5588_p5 }
 0x36a   : > { %p5465_p11 = por %p5464_p10, %p5463_p9 }
 0x36b   : > { %p5461_p8 = pneg %p5460_p7 }
 0x36c   : > { %p5467_p13 = por %p5466_p12, %p5465_p11 }
 0x36e   : > { %p5468_p0 = pnand %p5467_p13, %p5461_p8 }
 0x370   : > { %5471 = shalt.err (!%p5468_p0)
}
 0x371   : > { %5402 = dma.vmem_to_hbm [thread:$0]  (%p5588_p5), %s6781_s9, 128, %s6779_s15, %s3795_s16  }
 0x372 PF: > { %p5408_p1 = scmp.ge.s32.totalorder %s5506_s29, 2  ;;  %s3821_s30 = sand.u32 1, %s5494_s26  }
 0x373   : > { %s3822_s10 = scalar_lea.sflag [#allocation4], %s3821_s30 }
 0x374   : > { %p5405_p2 = pnand %p5408_p1, %p5592_p6 }
 0x376   : > { %5489 = dma.done.wait (!%p5405_p2), %s3822_s10, 128  }
 0x377   : > { %5491 = vsyncadd (!%p5405_p2), %s3822_s10, 4294967168  ;;  %p18_p3 = scmp.ge.s32.totalorder %s5576_s8, 5   ;;  %s6887_s26 = smov %s5498_s27 }
 0x378   : > { %s6888_s27 = smov %s5502_s28  ;;  %s6889_s28 = smov %s5586_s11 }
 0x379   : > { %s6890_s29 = smov %s5576_s8  ;;  %20 = sbr.rel (!%p18_p3) target bundleno = 5 (0x5), region = 86 }
 0x380   :  { %3827 = vsyncpa [#allocation4], 1 }
 0x381   :  { %3829 = vsyncpa [#allocation4 + $0x1], 1 }

</bundles_post_ra>
